<compile_context>
chip_gen: v7x
topology: tpu7x:2x2x1
jax: 0.10.0
libtpu: 0.0.40
codegen_flags: <defaults>
</compile_context>

<pallas_src>
import jax
import jax.numpy as jnp
from jax.experimental import pallas as pl
from jax.experimental.pallas import tpu as pltpu


def _spatial_attention_kernel(x_ref, w_ref, b_ref, o_ref):
    """Depthwise 3x3 conv (pad=1) + sigmoid on one NCHW block.

    x_ref : (BN, BC, H, W)   input block  (W on lanes, H on sublanes)
    w_ref : (9, BC, 1, 1)    per-channel taps, leading index k = (dh+1)*3+(dw+1)
    b_ref : (BC, 1, 1)       per-channel bias
    o_ref : (BN, BC, H, W)   output block
    """
    BN, BC, H, W = x_ref.shape
    x = x_ref[...].astype(jnp.float32)          # (BN, BC, H, W)
    w = w_ref[...].astype(jnp.float32)          # (9, BC, 1, 1) -- loaded once
    b = b_ref[...].astype(jnp.float32)          # (BC, 1, 1)

    # Boundary-validity masks: these replace the zero padding of the reference
    # conv (wrapped elements of the rolls are masked to zero).
    row = jax.lax.broadcasted_iota(jnp.int32, (1, 1, H, W), 2)
    col = jax.lax.broadcasted_iota(jnp.int32, (1, 1, H, W), 3)
    not_top = row >= 1            # valid region for dh == -1
    not_bottom = row < (H - 1)    # valid region for dh == +1
    not_left = col >= 1           # valid region for dw == -1
    not_right = col < (W - 1)     # valid region for dw == +1

    # Center tap (dh=0, dw=0): no shift, no mask.
    acc = x * w[4]

    for dh in (-1, 0, 1):
        for dw in (-1, 0, 1):
            if dh == 0 and dw == 0:
                continue
            k = (dh + 1) * 3 + (dw + 1)
            # shifted[..., i, j] = x[..., i + dh, j + dw]  (circular, fixed up
            # by the boundary mask below).  Rolls run on the XLU slot.
            s = x
            if dh != 0:
                s = pltpu.roll(s, shift=(-dh) % H, axis=2)
            if dw != 0:
                s = pltpu.roll(s, shift=(-dw) % W, axis=3)
            valid = None
            if dh == 1:
                valid = not_bottom
            elif dh == -1:
                valid = not_top
            if dw == 1:
                valid = not_right if valid is None else (valid & not_right)
            elif dw == -1:
                valid = not_left if valid is None else (valid & not_left)
            if valid is not None:
                s = jnp.where(valid, s, 0.0)
            acc = acc + s * w[k]

    acc = acc + b
    o_ref[...] = jax.nn.sigmoid(acc).astype(o_ref.dtype)


def _choose_blocks(N, C, H, W, itemsize, budget_bytes=1 << 20):
    """Pick (BN, BC): block sizes along batch / channel.

    BC must divide C and be a multiple of 8 (or equal C) so that the weight /
    bias BlockSpecs keep a legal second-to-last block dim.  Blocks are grown up
    to ~1 MiB so each grid step is a healthy DMA payload while 2x double-
    buffered in+out blocks stay far below the scoped-VMEM limit on all chips.
    """
    plane = H * W * itemsize
    cand = [c for c in range(1, C + 1)
            if C % c == 0 and (c == C or c % 8 == 0)]
    fitting = [c for c in cand if c * plane <= budget_bytes]
    bc = max(fitting) if fitting else min(cand)
    bn = 1
    for b in range(1, N + 1):
        if N % b == 0 and b * bc * plane <= budget_bytes:
            bn = b
    return bn, bc


def spatial_attention(x_nchw, weight, bias):
    """x_nchw: (N, C, H, W); weight: (C, 1, 3, 3) (PyTorch depthwise layout);
    bias: (C,).  Returns (N, C, H, W) = sigmoid(depthwise_conv3x3(x))."""
    N, C, H, W = x_nchw.shape
    itemsize = jnp.dtype(x_nchw.dtype).itemsize
    BN, BC = _choose_blocks(N, C, H, W, itemsize)

    # (C, 1, 3, 3) -> (9, C, 1, 1): leading index k = (dh+1)*3 + (dw+1).
    # (tiny arrays; this reshuffle costs ~nothing vs. the old full-tensor
    # transposes / padding of x).
    w9 = jnp.transpose(weight.reshape(C, 9), (1, 0)).reshape(9, C, 1, 1)
    b3 = bias.reshape(C, 1, 1)

    grid = (N // BN, C // BC)

    out = pl.pallas_call(
        _spatial_attention_kernel,
        out_shape=jax.ShapeDtypeStruct((N, C, H, W), x_nchw.dtype),
        grid_spec=pltpu.PrefetchScalarGridSpec(
            num_scalar_prefetch=0,
            grid=grid,
            in_specs=[
                pl.BlockSpec((BN, BC, H, W), lambda n, c: (n, c, 0, 0)),
                pl.BlockSpec((9, BC, 1, 1), lambda n, c: (0, c, 0, 0)),
                pl.BlockSpec((BC, 1, 1), lambda n, c: (c, 0, 0)),
            ],
            out_specs=pl.BlockSpec((BN, BC, H, W), lambda n, c: (n, c, 0, 0)),
        ),
        compiler_params=pltpu.CompilerParams(
            dimension_semantics=("parallel", "parallel"),
            vmem_limit_bytes=32 * 1024 * 1024,
        ),
    )(x_nchw, w9, b3)
    return out


def _reference(x_nchw, weight, bias):
    """Pure-JAX reference: depthwise conv2d (pad=1) + sigmoid."""
    N, C, H, W = x_nchw.shape
    y = jax.lax.conv_general_dilated(
        x_nchw.astype(jnp.float32),
        weight.astype(jnp.float32),            # (C, 1, 3, 3)
        window_strides=(1, 1),
        padding=((1, 1), (1, 1)),
        dimension_numbers=("NCHW", "OIHW", "NCHW"),
        feature_group_count=C,
    ) + bias.reshape(1, C, 1, 1)
    return jax.nn.sigmoid(y).astype(x_nchw.dtype)


if __name__ == "__main__":
    key = jax.random.PRNGKey(0)
    N, C, H, W = 2, 4, 16, 16   # small example: n_feats = C = 4

    kx, kw, kb = jax.random.split(key, 3)
    x = jax.random.normal(kx, (N, C, H, W), dtype=jnp.float32)
    # Deterministic synthetic parameters (shapes match nn.Conv2d(groups=C)).
    weight = jax.random.normal(kw, (C, 1, 3, 3), dtype=jnp.float32) * 0.1
    bias = jax.random.normal(kb, (C,), dtype=jnp.float32) * 0.1

    out = spatial_attention(x, weight, bias)
    out = jax.block_until_ready(out)

    ref = _reference(x, weight, bias)
    assert out.shape == (N, C, H, W)
    assert jnp.allclose(out, ref, atol=1e-5, rtol=1e-5)

    print("KERNEL_OK")
</pallas_src>

<mosaic_0001>
module attributes {stable_mosaic.version = 11 : i64} {
  func.func @_spatial_attention_kernel(%arg0: i32, %arg1: i32, %arg2: memref<2x4x16x16xf32, #tpu.memory_space<vmem>>, %arg3: memref<9x4x1x1xf32, #tpu.memory_space<vmem>>, %arg4: memref<4x1x1xf32, #tpu.memory_space<vmem>>, %arg5: memref<2x4x16x16xf32, #tpu.memory_space<vmem>>) attributes {dimension_semantics = [#tpu.dimension_semantics<parallel>, #tpu.dimension_semantics<parallel>], iteration_bounds = array<i64: 1, 1>, scalar_prefetch = 0 : i64, scratch_operands = 0 : i64, tpu.core_type = #tpu.core_type<tc>, window_params = [{transform_indices = @transform_0, window_bounds = array<i64: 2, 4, 16, 16>}, {transform_indices = @transform_1, window_bounds = array<i64: 9, 4, 1, 1>}, {transform_indices = @transform_2, window_bounds = array<i64: 4, 1, 1>}, {transform_indices = @transform_3, window_bounds = array<i64: 2, 4, 16, 16>}]} {
    %c0 = arith.constant 0 : index
    %c0_0 = arith.constant 0 : index
    %c0_1 = arith.constant 0 : index
    %c0_2 = arith.constant 0 : index
    %0 = vector.load %arg2[%c0, %c0_0, %c0_1, %c0_2] : memref<2x4x16x16xf32, #tpu.memory_space<vmem>>, vector<2x4x16x16xf32>
    %c0_3 = arith.constant 0 : index
    %c0_4 = arith.constant 0 : index
    %c0_5 = arith.constant 0 : index
    %c0_6 = arith.constant 0 : index
    %1 = vector.load %arg3[%c0_3, %c0_4, %c0_5, %c0_6] : memref<9x4x1x1xf32, #tpu.memory_space<vmem>>, vector<9x4x1x1xf32>
    %c0_7 = arith.constant 0 : index
    %c0_8 = arith.constant 0 : index
    %c0_9 = arith.constant 0 : index
    %2 = vector.load %arg4[%c0_7, %c0_8, %c0_9] : memref<4x1x1xf32, #tpu.memory_space<vmem>>, vector<4x1x1xf32>
    %3 = tpu.iota {dimensions = array<i32: 2>} : vector<1x1x16x16xi32>
    %4 = tpu.iota {dimensions = array<i32: 3>} : vector<1x1x16x16xi32>
    %c1_i32 = arith.constant 1 : i32
    %5 = vector.broadcast %c1_i32 : i32 to vector<1x1x16x16xi32>
    %6 = arith.cmpi sge, %3, %5 : vector<1x1x16x16xi32>
    %c15_i32 = arith.constant 15 : i32
    %7 = vector.broadcast %c15_i32 : i32 to vector<1x1x16x16xi32>
    %8 = arith.cmpi slt, %3, %7 : vector<1x1x16x16xi32>
    %c1_i32_10 = arith.constant 1 : i32
    %9 = vector.broadcast %c1_i32_10 : i32 to vector<1x1x16x16xi32>
    %10 = arith.cmpi sge, %4, %9 : vector<1x1x16x16xi32>
    %c15_i32_11 = arith.constant 15 : i32
    %11 = vector.broadcast %c15_i32_11 : i32 to vector<1x1x16x16xi32>
    %12 = arith.cmpi slt, %4, %11 : vector<1x1x16x16xi32>
    %13 = vector.extract_strided_slice %1 {offsets = [4, 0, 0, 0], sizes = [1, 4, 1, 1], strides = [1, 1, 1, 1]} : vector<9x4x1x1xf32> to vector<1x4x1x1xf32>
    %14 = vector.shape_cast %13 : vector<1x4x1x1xf32> to vector<4x1x1xf32>
    %15 = vector.shape_cast %14 : vector<4x1x1xf32> to vector<1x4x1x1xf32>
    %16 = vector.broadcast %15 : vector<1x4x1x1xf32> to vector<2x4x16x16xf32>
    %17 = arith.mulf %0, %16 : vector<2x4x16x16xf32>
    %c1_i32_12 = arith.constant 1 : i32
    %18 = tpu.dynamic_rotate %0 by %c1_i32_12 dim 2 : vector<2x4x16x16xf32>, i32 -> vector<2x4x16x16xf32>
    %c1_i32_13 = arith.constant 1 : i32
    %19 = tpu.dynamic_rotate %18 by %c1_i32_13 dim 3 : vector<2x4x16x16xf32>, i32 -> vector<2x4x16x16xf32>
    %20 = arith.andi %6, %10 : vector<1x1x16x16xi1>
    %cst = arith.constant 0.000000e+00 : f32
    %21 = vector.shape_cast %20 : vector<1x1x16x16xi1> to vector<1x1x16x16xi1>
    %22 = vector.broadcast %21 : vector<1x1x16x16xi1> to vector<2x4x16x16xi1>
    %23 = vector.broadcast %cst : f32 to vector<2x4x16x16xf32>
    %24 = arith.select %22, %19, %23 : vector<2x4x16x16xi1>, vector<2x4x16x16xf32>
    %25 = vector.extract_strided_slice %1 {offsets = [0, 0, 0, 0], sizes = [1, 4, 1, 1], strides = [1, 1, 1, 1]} : vector<9x4x1x1xf32> to vector<1x4x1x1xf32>
    %26 = vector.shape_cast %25 : vector<1x4x1x1xf32> to vector<4x1x1xf32>
    %27 = vector.shape_cast %26 : vector<4x1x1xf32> to vector<1x4x1x1xf32>
    %28 = vector.broadcast %27 : vector<1x4x1x1xf32> to vector<2x4x16x16xf32>
    %29 = arith.mulf %24, %28 : vector<2x4x16x16xf32>
    %30 = arith.addf %17, %29 : vector<2x4x16x16xf32>
    %c1_i32_14 = arith.constant 1 : i32
    %31 = tpu.dynamic_rotate %0 by %c1_i32_14 dim 2 : vector<2x4x16x16xf32>, i32 -> vector<2x4x16x16xf32>
    %cst_15 = arith.constant 0.000000e+00 : f32
    %32 = vector.shape_cast %6 : vector<1x1x16x16xi1> to vector<1x1x16x16xi1>
    %33 = vector.broadcast %32 : vector<1x1x16x16xi1> to vector<2x4x16x16xi1>
    %34 = vector.broadcast %cst_15 : f32 to vector<2x4x16x16xf32>
    %35 = arith.select %33, %31, %34 : vector<2x4x16x16xi1>, vector<2x4x16x16xf32>
    %36 = vector.extract_strided_slice %1 {offsets = [1, 0, 0, 0], sizes = [1, 4, 1, 1], strides = [1, 1, 1, 1]} : vector<9x4x1x1xf32> to vector<1x4x1x1xf32>
    %37 = vector.shape_cast %36 : vector<1x4x1x1xf32> to vector<4x1x1xf32>
    %38 = vector.shape_cast %37 : vector<4x1x1xf32> to vector<1x4x1x1xf32>
    %39 = vector.broadcast %38 : vector<1x4x1x1xf32> to vector<2x4x16x16xf32>
    %40 = arith.mulf %35, %39 : vector<2x4x16x16xf32>
    %41 = arith.addf %30, %40 : vector<2x4x16x16xf32>
    %c1_i32_16 = arith.constant 1 : i32
    %42 = tpu.dynamic_rotate %0 by %c1_i32_16 dim 2 : vector<2x4x16x16xf32>, i32 -> vector<2x4x16x16xf32>
    %c15_i32_17 = arith.constant 15 : i32
    %43 = tpu.dynamic_rotate %42 by %c15_i32_17 dim 3 : vector<2x4x16x16xf32>, i32 -> vector<2x4x16x16xf32>
    %44 = arith.andi %6, %12 : vector<1x1x16x16xi1>
    %cst_18 = arith.constant 0.000000e+00 : f32
    %45 = vector.shape_cast %44 : vector<1x1x16x16xi1> to vector<1x1x16x16xi1>
    %46 = vector.broadcast %45 : vector<1x1x16x16xi1> to vector<2x4x16x16xi1>
    %47 = vector.broadcast %cst_18 : f32 to vector<2x4x16x16xf32>
    %48 = arith.select %46, %43, %47 : vector<2x4x16x16xi1>, vector<2x4x16x16xf32>
    %49 = vector.extract_strided_slice %1 {offsets = [2, 0, 0, 0], sizes = [1, 4, 1, 1], strides = [1, 1, 1, 1]} : vector<9x4x1x1xf32> to vector<1x4x1x1xf32>
    %50 = vector.shape_cast %49 : vector<1x4x1x1xf32> to vector<4x1x1xf32>
    %51 = vector.shape_cast %50 : vector<4x1x1xf32> to vector<1x4x1x1xf32>
    %52 = vector.broadcast %51 : vector<1x4x1x1xf32> to vector<2x4x16x16xf32>
    %53 = arith.mulf %48, %52 : vector<2x4x16x16xf32>
    %54 = arith.addf %41, %53 : vector<2x4x16x16xf32>
    %c1_i32_19 = arith.constant 1 : i32
    %55 = tpu.dynamic_rotate %0 by %c1_i32_19 dim 3 : vector<2x4x16x16xf32>, i32 -> vector<2x4x16x16xf32>
    %cst_20 = arith.constant 0.000000e+00 : f32
    %56 = vector.shape_cast %10 : vector<1x1x16x16xi1> to vector<1x1x16x16xi1>
    %57 = vector.broadcast %56 : vector<1x1x16x16xi1> to vector<2x4x16x16xi1>
    %58 = vector.broadcast %cst_20 : f32 to vector<2x4x16x16xf32>
    %59 = arith.select %57, %55, %58 : vector<2x4x16x16xi1>, vector<2x4x16x16xf32>
    %60 = vector.extract_strided_slice %1 {offsets = [3, 0, 0, 0], sizes = [1, 4, 1, 1], strides = [1, 1, 1, 1]} : vector<9x4x1x1xf32> to vector<1x4x1x1xf32>
    %61 = vector.shape_cast %60 : vector<1x4x1x1xf32> to vector<4x1x1xf32>
    %62 = vector.shape_cast %61 : vector<4x1x1xf32> to vector<1x4x1x1xf32>
    %63 = vector.broadcast %62 : vector<1x4x1x1xf32> to vector<2x4x16x16xf32>
    %64 = arith.mulf %59, %63 : vector<2x4x16x16xf32>
    %65 = arith.addf %54, %64 : vector<2x4x16x16xf32>
    %c15_i32_21 = arith.constant 15 : i32
    %66 = tpu.dynamic_rotate %0 by %c15_i32_21 dim 3 : vector<2x4x16x16xf32>, i32 -> vector<2x4x16x16xf32>
    %cst_22 = arith.constant 0.000000e+00 : f32
    %67 = vector.shape_cast %12 : vector<1x1x16x16xi1> to vector<1x1x16x16xi1>
    %68 = vector.broadcast %67 : vector<1x1x16x16xi1> to vector<2x4x16x16xi1>
    %69 = vector.broadcast %cst_22 : f32 to vector<2x4x16x16xf32>
    %70 = arith.select %68, %66, %69 : vector<2x4x16x16xi1>, vector<2x4x16x16xf32>
    %71 = vector.extract_strided_slice %1 {offsets = [5, 0, 0, 0], sizes = [1, 4, 1, 1], strides = [1, 1, 1, 1]} : vector<9x4x1x1xf32> to vector<1x4x1x1xf32>
    %72 = vector.shape_cast %71 : vector<1x4x1x1xf32> to vector<4x1x1xf32>
    %73 = vector.shape_cast %72 : vector<4x1x1xf32> to vector<1x4x1x1xf32>
    %74 = vector.broadcast %73 : vector<1x4x1x1xf32> to vector<2x4x16x16xf32>
    %75 = arith.mulf %70, %74 : vector<2x4x16x16xf32>
    %76 = arith.addf %65, %75 : vector<2x4x16x16xf32>
    %c15_i32_23 = arith.constant 15 : i32
    %77 = tpu.dynamic_rotate %0 by %c15_i32_23 dim 2 : vector<2x4x16x16xf32>, i32 -> vector<2x4x16x16xf32>
    %c1_i32_24 = arith.constant 1 : i32
    %78 = tpu.dynamic_rotate %77 by %c1_i32_24 dim 3 : vector<2x4x16x16xf32>, i32 -> vector<2x4x16x16xf32>
    %79 = arith.andi %8, %10 : vector<1x1x16x16xi1>
    %cst_25 = arith.constant 0.000000e+00 : f32
    %80 = vector.shape_cast %79 : vector<1x1x16x16xi1> to vector<1x1x16x16xi1>
    %81 = vector.broadcast %80 : vector<1x1x16x16xi1> to vector<2x4x16x16xi1>
    %82 = vector.broadcast %cst_25 : f32 to vector<2x4x16x16xf32>
    %83 = arith.select %81, %78, %82 : vector<2x4x16x16xi1>, vector<2x4x16x16xf32>
    %84 = vector.extract_strided_slice %1 {offsets = [6, 0, 0, 0], sizes = [1, 4, 1, 1], strides = [1, 1, 1, 1]} : vector<9x4x1x1xf32> to vector<1x4x1x1xf32>
    %85 = vector.shape_cast %84 : vector<1x4x1x1xf32> to vector<4x1x1xf32>
    %86 = vector.shape_cast %85 : vector<4x1x1xf32> to vector<1x4x1x1xf32>
    %87 = vector.broadcast %86 : vector<1x4x1x1xf32> to vector<2x4x16x16xf32>
    %88 = arith.mulf %83, %87 : vector<2x4x16x16xf32>
    %89 = arith.addf %76, %88 : vector<2x4x16x16xf32>
    %c15_i32_26 = arith.constant 15 : i32
    %90 = tpu.dynamic_rotate %0 by %c15_i32_26 dim 2 : vector<2x4x16x16xf32>, i32 -> vector<2x4x16x16xf32>
    %cst_27 = arith.constant 0.000000e+00 : f32
    %91 = vector.shape_cast %8 : vector<1x1x16x16xi1> to vector<1x1x16x16xi1>
    %92 = vector.broadcast %91 : vector<1x1x16x16xi1> to vector<2x4x16x16xi1>
    %93 = vector.broadcast %cst_27 : f32 to vector<2x4x16x16xf32>
    %94 = arith.select %92, %90, %93 : vector<2x4x16x16xi1>, vector<2x4x16x16xf32>
    %95 = vector.extract_strided_slice %1 {offsets = [7, 0, 0, 0], sizes = [1, 4, 1, 1], strides = [1, 1, 1, 1]} : vector<9x4x1x1xf32> to vector<1x4x1x1xf32>
    %96 = vector.shape_cast %95 : vector<1x4x1x1xf32> to vector<4x1x1xf32>
    %97 = vector.shape_cast %96 : vector<4x1x1xf32> to vector<1x4x1x1xf32>
    %98 = vector.broadcast %97 : vector<1x4x1x1xf32> to vector<2x4x16x16xf32>
    %99 = arith.mulf %94, %98 : vector<2x4x16x16xf32>
    %100 = arith.addf %89, %99 : vector<2x4x16x16xf32>
    %c15_i32_28 = arith.constant 15 : i32
    %101 = tpu.dynamic_rotate %0 by %c15_i32_28 dim 2 : vector<2x4x16x16xf32>, i32 -> vector<2x4x16x16xf32>
    %c15_i32_29 = arith.constant 15 : i32
    %102 = tpu.dynamic_rotate %101 by %c15_i32_29 dim 3 : vector<2x4x16x16xf32>, i32 -> vector<2x4x16x16xf32>
    %103 = arith.andi %8, %12 : vector<1x1x16x16xi1>
    %cst_30 = arith.constant 0.000000e+00 : f32
    %104 = vector.shape_cast %103 : vector<1x1x16x16xi1> to vector<1x1x16x16xi1>
    %105 = vector.broadcast %104 : vector<1x1x16x16xi1> to vector<2x4x16x16xi1>
    %106 = vector.broadcast %cst_30 : f32 to vector<2x4x16x16xf32>
    %107 = arith.select %105, %102, %106 : vector<2x4x16x16xi1>, vector<2x4x16x16xf32>
    %108 = vector.extract_strided_slice %1 {offsets = [8, 0, 0, 0], sizes = [1, 4, 1, 1], strides = [1, 1, 1, 1]} : vector<9x4x1x1xf32> to vector<1x4x1x1xf32>
    %109 = vector.shape_cast %108 : vector<1x4x1x1xf32> to vector<4x1x1xf32>
    %110 = vector.shape_cast %109 : vector<4x1x1xf32> to vector<1x4x1x1xf32>
    %111 = vector.broadcast %110 : vector<1x4x1x1xf32> to vector<2x4x16x16xf32>
    %112 = arith.mulf %107, %111 : vector<2x4x16x16xf32>
    %113 = arith.addf %100, %112 : vector<2x4x16x16xf32>
    %114 = vector.shape_cast %2 : vector<4x1x1xf32> to vector<1x4x1x1xf32>
    %115 = vector.broadcast %114 : vector<1x4x1x1xf32> to vector<2x4x16x16xf32>
    %116 = arith.addf %113, %115 : vector<2x4x16x16xf32>
    %117 = arith.negf %116 : vector<2x4x16x16xf32>
    %118 = math.exp %117 : vector<2x4x16x16xf32>
    %cst_31 = arith.constant 1.000000e+00 : f32
    %119 = vector.broadcast %cst_31 : f32 to vector<2x4x16x16xf32>
    %120 = arith.addf %119, %118 : vector<2x4x16x16xf32>
    %121 = arith.divf %119, %120 : vector<2x4x16x16xf32>
    %c0_32 = arith.constant 0 : index
    %c0_33 = arith.constant 0 : index
    %c0_34 = arith.constant 0 : index
    %c0_35 = arith.constant 0 : index
    %122 = vector.load %arg5[%c0_32, %c0_33, %c0_34, %c0_35] : memref<2x4x16x16xf32, #tpu.memory_space<vmem>>, vector<2x4x16x16xf32>
    tpu.vector_store %arg5[%c0_32, %c0_33, %c0_34, %c0_35], %121 {strides = array<i32>} : memref<2x4x16x16xf32, #tpu.memory_space<vmem>>, vector<2x4x16x16xf32>,
    return
  }
  func.func @transform_0(%arg0: i32, %arg1: i32) -> (i32, i32, i32, i32) {
    %c0_i32 = arith.constant 0 : i32
    %c0_i32_0 = arith.constant 0 : i32
    %c0_i32_1 = arith.constant 0 : i32
    return %arg0, %arg1, %c0_i32, %c0_i32_0 : i32, i32, i32, i32
  }
  func.func @transform_1(%arg0: i32, %arg1: i32) -> (i32, i32, i32, i32) {
    %c0_i32 = arith.constant 0 : i32
    %c0_i32_0 = arith.constant 0 : i32
    %c0_i32_1 = arith.constant 0 : i32
    %c0_i32_2 = arith.constant 0 : i32
    return %c0_i32, %arg1, %c0_i32_0, %c0_i32_1 : i32, i32, i32, i32
  }
  func.func @transform_2(%arg0: i32, %arg1: i32) -> (i32, i32, i32) {
    %c0_i32 = arith.constant 0 : i32
    %c0_i32_0 = arith.constant 0 : i32
    %c0_i32_1 = arith.constant 0 : i32
    return %arg1, %c0_i32, %c0_i32_0 : i32, i32, i32
  }
  func.func @transform_3(%arg0: i32, %arg1: i32) -> (i32, i32, i32, i32) {
    %c0_i32 = arith.constant 0 : i32
    %c0_i32_0 = arith.constant 0 : i32
    %c0_i32_1 = arith.constant 0 : i32
    return %arg0, %arg1, %c0_i32, %c0_i32_0 : i32, i32, i32, i32
  }
}

</mosaic_0001>

<bundles_post_ra>
// kernel: tpu_custom_call.1
= control target key start
LH: loop header
LB: loop body
LE: loop exit
PB: predicated region body
PF: predicated region fallthrough
CT: control target
= control target key end

     0   :  { %8 = vsyncpa [#allocation3], 0  ;;  %s3741_s0 = inlined_call_operand.hbm [shape: f32[2,4,16,16], index: 0, kind: input, shape index: {}]   ;;  %s3742_s1 = inlined_call_operand.vmem [shape: f32[9,4,1,1], index: 1, kind: input, shape index: {}]   ;;  %s3743_s2 = inlined_call_operand.vmem [shape: f32[4,1,1], index: 2, kind: input, shape index: {}]   ;;  %s3744_s3 = inlined_call_operand.hbm [shape: f32[2,4,16,16], index: 3, kind: output, shape index: {}]  }
   0x1   :  { %9 = vsyncpa [#allocation4], 0  ;;  %s1907_s12 = smov [#allocation2]   ;;  %s1859_s16 = scalar_lea.hbm %s3741_s0, 2048 }
   0x2   :  { %s15_s13 = sshll.u32 %s1907_s12, 4  ;;  %p1860_p0 = scmp.ne.s32.totalorder %s3741_s0, %s1859_s16  ;;  %s16_s13 = int_to_ptr.vmem [resolvable:$true] %s15_s13 }
   0x3   :  { %p1863_p1 = scmp.lt.u32.totalorder %s1859_s16, %s3741_s0 }
   0x5   :  { %p1865_p2 = pnand %p1863_p1, %p1860_p0 }
   0x7   :  { %1868 = shalt.err (!%p1865_p2)
}
   0x8   :  { %s1869_s21 = scalar_lea.vmem %s16_s13, 2048  ;;  %p1874_p4 = scmp.lt.s32.totalorder %s16_s13, %s16_s13 }
   0x9   :  { %p1870_p3 = scmp.ne.s32.totalorder %s16_s13, %s1869_s21  ;;  %p1875_p5 = scmp.lt.s32.totalorder %s1869_s21, %s1869_s21 }
   0xb   :  { %p1876_p6 = por %p1875_p5, %p1874_p4 }
   0xd   :  { %p1877_p7 = pnand %p1876_p6, %p1870_p3 }
   0xf   :  { %1880 = shalt.err (!%p1877_p7)
}
  0x10   :  { %s1908_s22 = smov 128   ;;  %s1909_s23 = smov 8  }
  0x11   :  { %21 = dma.hbm_to_vmem [thread:$0]  %s3741_s0, 2048, %s16_s13, [#allocation3], %s1908_s22, %s1908_s22, %s1909_s23  }
  0x12   :  { %1903 = dma.done.wait [#allocation3], 2048  }
  0x13   :  { %1904 = vsyncadd [#allocation3], 4294965248  ;;  %v1910_v0 = vmov 0   ;;  %v3745_v1 = vlaneseq  ;;  %v1731_v3 = vld [vmem:[%s3742_s1 + $0x12] ss:$0 sm:$0xff]  ;;  %v1959_v5 = vld [vmem:[#allocation2] sm:$0xff] }
  0x14   :  { %1794 = vset.pattern.permute.xlu1 %v1910_v0  ;;  %1793 = vset.pattern.permute.xlu0 %v1910_v0  ;;  %v1729_v4 = vld [vmem:[%s3742_s1 + $0x10] ss:$0 sm:$0xff]  ;;  %v1961_v6 = vld [vmem:[#allocation2 + $0x8] sm:$0xff]  ;;  %v1732_v7 = vld [vmem:[%s3742_s1 + $0x13] ss:$0 sm:$0xff]  ;;  %v148_v9 = vrot.slane %v1959_v5, 7 }
  0x15   :  { %v1951_v2 = vshrl.u32 %v3745_v1, 7  ;;  %125 = vperm.xlu1 %1794, %v1731_v3   ;;  %117 = vperm.xlu0 %1793, %v1729_v4   ;;  %v1730_v8 = vld [vmem:[%s3742_s1 + $0x11] ss:$0 sm:$0xff]  ;;  %v156_v10 = vrot.slane %v1961_v6, 7  ;;  %v1974_v12 = vld [vmem:[#allocation2 + $0x18] sm:$0xff]  ;;  %v1986_v17 = vld [vmem:[#allocation2 + $0x20] sm:$0xff] }
  0x16   :  { %v1972_v11 = vld [vmem:[#allocation2 + $0x10] sm:$0xff]  ;;  %v157_v16 = vrot.slane %v1974_v12, 7  ;;  %v1988_v18 = vld [vmem:[#allocation2 + $0x28] sm:$0xff]  ;;  %s1911_s6 = smov 16   ;;  %v150_v21 = vrot.slane %v1986_v17, 7  ;;  %v2006_v24 = vld [vmem:[#allocation2 + $0x38] sm:$0xff] }
  0x17   :  { %3798 = vst [vmem:[#allocation8_spill] sm:$0xff] %v1951_v2  ;;  %vm164_vm0 = vcmp.lt.s32.totalorder %v1951_v2, 1  ;;  %v149_v15 = vrot.slane %v1972_v11, 7  ;;  %v158_v22 = vrot.slane %v1988_v18, 7  ;;  %v2004_v23 = vld [vmem:[#allocation2 + $0x30] sm:$0xff]  ;;  %v159_v28 = vrot.slane %v2006_v24, 7 }
  0x18   :  { %v1978_v13 = vsel %vm164_vm0, %v156_v10, %v148_v9  ;;  %v1982_v14 = vsel %vm164_vm0, %v148_v9, %v156_v10  ;;  %v151_v27 = vrot.slane %v2004_v23, 7  ;;  %v2022_v29 = vld [vmem:[#allocation2 + $0x40] sm:$0xff]  ;;  %v2024_v30 = vld [vmem:[#allocation2 + $0x48] sm:$0xff]  ;;  %v2040_v35 = vld [vmem:[#allocation2 + $0x50] sm:$0xff]  ;;  %vm181_vm1 = vcmask 1047680   ;;  %s1912_s5 = smov 113  }
  0x19   :  { %129 = vperm.xlu1 %1794, %v1732_v7   ;;  %121 = vperm.xlu0 %1793, %v1730_v8   ;;  %v1996_v19 = vsel %vm164_vm0, %v157_v16, %v149_v15  ;;  %v2000_v20 = vsel %vm164_vm0, %v149_v15, %v157_v16  ;;  %v2014_v25 = vsel %vm164_vm0, %v158_v22, %v150_v21  ;;  %v152_v33 = vrot.slane %v2022_v29, 7  ;;  %v2042_v36 = vld [vmem:[#allocation2 + $0x58] sm:$0xff]  ;;  %v2058_v41 = vld [vmem:[#allocation2 + $0x60] sm:$0xff]  ;;  %v2060_v42 = vld [vmem:[#allocation2 + $0x68] sm:$0xff]  ;;  %s1913_s7 = smov 127  }
  0x1a   :  { %v2018_v26 = vsel %vm164_vm0, %v150_v21, %v158_v22  ;;  %v2032_v31 = vsel %vm164_vm0, %v159_v28, %v151_v27  ;;  %v2036_v32 = vsel %vm164_vm0, %v151_v27, %v159_v28  ;;  %v160_v34 = vrot.slane %v2024_v30, 7  ;;  %v2076_v47 = vld [vmem:[#allocation2 + $0x70] sm:$0xff]  ;;  %v2078_v48 = vld [vmem:[#allocation2 + $0x78] sm:$0xff]  ;;  %v1733_v55 = vld [vmem:[%s3742_s1] ss:$0 sm:$0xff] }
  0x1b   :  { %v153_v39 = vrot.slane %v2040_v35, 7  ;;  %v161_v40 = vrot.slane %v2042_v36, 7  ;;  %v154_v45 = vrot.slane %v2058_v41, 7  ;;  %v162_v46 = vrot.slane %v2060_v42, 7  ;;  %v1734_v56 = vld [vmem:[%s3742_s1 + $0x1] ss:$0 sm:$0xff] }
  0x1c   :  { %v2050_v37 = vsel %vm164_vm0, %v160_v34, %v152_v33  ;;  %v2054_v38 = vsel %vm164_vm0, %v152_v33, %v160_v34  ;;  %v155_v51 = vrot.slane %v2076_v47, 7  ;;  %v163_v52 = vrot.slane %v2078_v48, 7  ;;  %v1735_v57 = vld [vmem:[%s3742_s1 + $0x2] ss:$0 sm:$0xff]  ;;  %v1736_v58 = vld [vmem:[%s3742_s1 + $0x3] ss:$0 sm:$0xff] }
  0x1d   :  { %182 = vrot.lane.b32.xlu0 %v1978_v13, %s1911_s6  ;;  %185 = vrot.lane.b32.xlu1 %v1982_v14, %s1911_s6  ;;  %v2068_v43 = vsel %vm164_vm0, %v161_v40, %v153_v39  ;;  %v2072_v44 = vsel %vm164_vm0, %v153_v39, %v161_v40  ;;  %v2086_v49 = vsel %vm164_vm0, %v162_v46, %v154_v45  ;;  %v1737_v59 = vld [vmem:[%s3742_s1 + $0x4] ss:$0 sm:$0xff]  ;;  %v1738_v60 = vld [vmem:[%s3742_s1 + $0x5] ss:$0 sm:$0xff]  ;;  %vm1054_vm2 = vcmp.lt.s32.totalorder %v1951_v2, 7 }
  0x1e   :  { %v2090_v50 = vsel %vm164_vm0, %v154_v45, %v162_v46  ;;  %v2100_v53 = vsel %vm164_vm0, %v163_v52, %v155_v51  ;;  %v2104_v54 = vsel %vm164_vm0, %v155_v51, %v163_v52  ;;  %v1739_v61 = vld [vmem:[%s3742_s1 + $0x6] ss:$0 sm:$0xff]  ;;  %v1740_v62 = vld [vmem:[%s3742_s1 + $0x7] ss:$0 sm:$0xff]  ;;  %v1741_v63 = vld [vmem:[%s3742_s1 + $0x8] ss:$0 sm:$0xff] }
  0x1f   :  { %v1742_v0 = vld [vmem:[%s3742_s1 + $0x9] ss:$0 sm:$0xff]  ;;  %v1743_v3 = vld [vmem:[%s3742_s1 + $0xa] ss:$0 sm:$0xff]  ;;  %v1744_v4 = vld [vmem:[%s3742_s1 + $0xb] ss:$0 sm:$0xff] }
  0x20   :  { %vm90_vm3 = vcmp.ge.s32.totalorder %v1951_v2, 1  ;;  %vm1695_vm11 = vcmask 130048  }
  0x21   :  { %188 = vrot.lane.b32.xlu0 %v1996_v19, %s1911_s6  ;;  %191 = vrot.lane.b32.xlu1 %v2000_v20, %s1911_s6 }
  0x25   :  { %194 = vrot.lane.b32.xlu0 %v2014_v25, %s1911_s6  ;;  %197 = vrot.lane.b32.xlu1 %v2018_v26, %s1911_s6 }
  0x29   :  { %200 = vrot.lane.b32.xlu0 %v2032_v31, %s1911_s6  ;;  %203 = vrot.lane.b32.xlu1 %v2036_v32, %s1911_s6 }
  0x2d   :  { %206 = vrot.lane.b32.xlu0 %v2050_v37, %s1911_s6  ;;  %209 = vrot.lane.b32.xlu1 %v2054_v38, %s1911_s6 }
  0x31   :  { %212 = vrot.lane.b32.xlu0 %v2068_v43, %s1911_s6  ;;  %215 = vrot.lane.b32.xlu1 %v2072_v44, %s1911_s6 }
  0x35   :  { %218 = vrot.lane.b32.xlu0 %v2086_v49, %s1911_s6  ;;  %221 = vrot.lane.b32.xlu1 %v2090_v50, %s1911_s6 }
  0x39   :  { %224 = vrot.lane.b32.xlu0 %v2100_v53, %s1911_s6  ;;  %227 = vrot.lane.b32.xlu1 %v2104_v54, %s1911_s6 }
  0x3d   :  { %385 = vperm.xlu0 %1793, %v1733_v55   ;;  %389 = vperm.xlu1 %1794, %v1734_v56  }
  0x41   :  { %393 = vperm.xlu0 %1793, %v1735_v57   ;;  %397 = vperm.xlu1 %1794, %v1736_v58  }
  0x45   :  { %473 = vperm.xlu0 %1793, %v1737_v59   ;;  %477 = vperm.xlu1 %1794, %v1738_v60  }
  0x49   :  { %481 = vperm.xlu0 %1793, %v1739_v61   ;;  %485 = vperm.xlu1 %1794, %v1740_v62  }
  0x4d   :  { %611 = vperm.xlu0 %1793, %v1741_v63   ;;  %615 = vperm.xlu1 %1794, %v1742_v0  }
  0x51   :  { %619 = vperm.xlu0 %1793, %v1743_v3   ;;  %623 = vperm.xlu1 %1794, %v1744_v4  }
  0x55   :  { %658 = vrot.lane.b32.xlu0 %v1959_v5, %s1911_s6  ;;  %661 = vrot.lane.b32.xlu1 %v1961_v6, %s1911_s6 }
  0x59   :  { %664 = vrot.lane.b32.xlu0 %v1972_v11, %s1911_s6  ;;  %667 = vrot.lane.b32.xlu1 %v1974_v12, %s1911_s6 }
  0x5d   :  { %670 = vrot.lane.b32.xlu0 %v1986_v17, %s1911_s6  ;;  %673 = vrot.lane.b32.xlu1 %v1988_v18, %s1911_s6 }
  0x61   :  { %676 = vrot.lane.b32.xlu0 %v2004_v23, %s1911_s6  ;;  %679 = vrot.lane.b32.xlu1 %v2006_v24, %s1911_s6 }
  0x65   :  { %682 = vrot.lane.b32.xlu0 %v2022_v29, %s1911_s6  ;;  %685 = vrot.lane.b32.xlu1 %v2024_v30, %s1911_s6 }
  0x69   :  { %688 = vrot.lane.b32.xlu0 %v2040_v35, %s1911_s6  ;;  %691 = vrot.lane.b32.xlu1 %v2042_v36, %s1911_s6 }
  0x6d   :  { %694 = vrot.lane.b32.xlu0 %v2058_v41, %s1911_s6  ;;  %697 = vrot.lane.b32.xlu1 %v2060_v42, %s1911_s6 }
  0x71   :  { %700 = vrot.lane.b32.xlu0 %v2076_v47, %s1911_s6  ;;  %703 = vrot.lane.b32.xlu1 %v2078_v48, %s1911_s6 }
  0x94   :  { %v2178_v7 = vpop.permute.xlu1 %125  ;;  %v2180_v8 = vpop.permute.xlu0 %117 }
  0x95   :  { %3799 = vst [vmem:[#allocation9_spill] sm:$0xff] %v2178_v7 }
  0x98   :  { %v2182_v9 = vpop.permute.xlu1 %129  ;;  %v2184_v10 = vpop.permute.xlu0 %121 }
  0x99   :  { %3800 = vst [vmem:[#allocation10_spill] sm:$0xff] %v2182_v9  ;;  %3801 = vst [vmem:[#allocation11_spill] sm:$0xff] %v2184_v10 }
  0x9c   :  { %v183_v15 = vpop.permute.xlu0 %182  ;;  %v186_v16 = vpop.permute.xlu1 %185 }
  0x9d   :  { %v184_v21 = vsel %vm181_vm1, %v183_v15, %v1978_v13  ;;  %v187_v22 = vsel %vm181_vm1, %v186_v16, %v1982_v14 }
  0x9e   :  { %230 = vrot.lane.b32.xlu0 %v184_v21, %s1911_s6  ;;  %232 = vrot.lane.b32.xlu1 %v187_v22, %s1911_s6 }
  0xa0   :  { %v189_v27 = vpop.permute.xlu0 %188  ;;  %v192_v28 = vpop.permute.xlu1 %191 }
  0xa1   :  { %v190_v33 = vsel %vm181_vm1, %v189_v27, %v1996_v19  ;;  %v193_v34 = vsel %vm181_vm1, %v192_v28, %v2000_v20 }
  0xa2   :  { %234 = vrot.lane.b32.xlu0 %v190_v33, %s1911_s6  ;;  %236 = vrot.lane.b32.xlu1 %v193_v34, %s1911_s6 }
  0xa4   :  { %v195_v39 = vpop.permute.xlu0 %194  ;;  %v198_v40 = vpop.permute.xlu1 %197 }
  0xa5   :  { %v196_v45 = vsel %vm181_vm1, %v195_v39, %v2014_v25  ;;  %v199_v46 = vsel %vm181_vm1, %v198_v40, %v2018_v26 }
  0xa6   :  { %238 = vrot.lane.b32.xlu0 %v196_v45, %s1911_s6  ;;  %240 = vrot.lane.b32.xlu1 %v199_v46, %s1911_s6 }
  0xa8   :  { %v201_v51 = vpop.permute.xlu0 %200  ;;  %v204_v52 = vpop.permute.xlu1 %203 }
  0xa9   :  { %v202_v55 = vsel %vm181_vm1, %v201_v51, %v2032_v31  ;;  %v205_v56 = vsel %vm181_vm1, %v204_v52, %v2036_v32 }
  0xaa   :  { %242 = vrot.lane.b32.xlu0 %v202_v55, %s1911_s6  ;;  %244 = vrot.lane.b32.xlu1 %v205_v56, %s1911_s6 }
  0xac   :  { %v207_v57 = vpop.permute.xlu0 %206  ;;  %v210_v58 = vpop.permute.xlu1 %209 }
  0xad   :  { %v208_v59 = vsel %vm181_vm1, %v207_v57, %v2050_v37  ;;  %v211_v60 = vsel %vm181_vm1, %v210_v58, %v2054_v38 }
  0xae   :  { %246 = vrot.lane.b32.xlu0 %v208_v59, %s1911_s6  ;;  %248 = vrot.lane.b32.xlu1 %v211_v60, %s1911_s6 }
  0xb0   :  { %v213_v61 = vpop.permute.xlu0 %212  ;;  %v216_v62 = vpop.permute.xlu1 %215 }
  0xb1   :  { %v214_v63 = vsel %vm181_vm1, %v213_v61, %v2068_v43  ;;  %v217_v0 = vsel %vm181_vm1, %v216_v62, %v2072_v44 }
  0xb2   :  { %250 = vrot.lane.b32.xlu0 %v214_v63, %s1911_s6  ;;  %252 = vrot.lane.b32.xlu1 %v217_v0, %s1911_s6 }
  0xb4   :  { %v219_v3 = vpop.permute.xlu0 %218  ;;  %v222_v4 = vpop.permute.xlu1 %221 }
  0xb5   :  { %v220_v15 = vsel %vm181_vm1, %v219_v3, %v2086_v49  ;;  %v223_v16 = vsel %vm181_vm1, %v222_v4, %v2090_v50 }
  0xb6   :  { %254 = vrot.lane.b32.xlu0 %v220_v15, %s1911_s6  ;;  %256 = vrot.lane.b32.xlu1 %v223_v16, %s1911_s6 }
  0xb8   :  { %v225_v21 = vpop.permute.xlu0 %224  ;;  %v228_v22 = vpop.permute.xlu1 %227 }
  0xb9   :  { %v226_v27 = vsel %vm181_vm1, %v225_v21, %v2100_v53  ;;  %v229_v28 = vsel %vm181_vm1, %v228_v22, %v2104_v54 }
  0xba   :  { %258 = vrot.lane.b32.xlu0 %v226_v27, %s1911_s6  ;;  %260 = vrot.lane.b32.xlu1 %v229_v28, %s1911_s6 }
  0xbc   :  { %v2234_v33 = vpop.permute.xlu0 %385  ;;  %v2236_v34 = vpop.permute.xlu1 %389 }
  0xbd   :  { %3802 = vst [vmem:[#allocation12_spill] sm:$0xff] %v2234_v33  ;;  %3803 = vst [vmem:[#allocation13_spill] sm:$0xff] %v2236_v34 }
  0xc0   :  { %v2238_v39 = vpop.permute.xlu0 %393  ;;  %v2240_v40 = vpop.permute.xlu1 %397 }
  0xc1   :  { %3804 = vst [vmem:[#allocation14_spill] sm:$0xff] %v2238_v39  ;;  %3805 = vst [vmem:[#allocation15_spill] sm:$0xff] %v2240_v40 }
  0xc4   :  { %v2242_v45 = vpop.permute.xlu0 %473  ;;  %v2244_v46 = vpop.permute.xlu1 %477 }
  0xc5   :  { %3806 = vst [vmem:[#allocation16_spill] sm:$0xff] %v2242_v45  ;;  %3807 = vst [vmem:[#allocation17_spill] sm:$0xff] %v2244_v46 }
  0xc8   :  { %v2246_v51 = vpop.permute.xlu0 %481  ;;  %v2248_v52 = vpop.permute.xlu1 %485 }
  0xc9   :  { %3808 = vst [vmem:[#allocation18_spill] sm:$0xff] %v2246_v51  ;;  %3809 = vst [vmem:[#allocation19_spill] sm:$0xff] %v2248_v52 }
  0xcc   :  { %v2250_v55 = vpop.permute.xlu0 %611  ;;  %v2252_v56 = vpop.permute.xlu1 %615 }
  0xcd   :  { %3810 = vst [vmem:[#allocation20_spill] sm:$0xff] %v2250_v55  ;;  %3811 = vst [vmem:[#allocation21_spill] sm:$0xff] %v2252_v56 }
  0xd0   :  { %v2254_v57 = vpop.permute.xlu0 %619  ;;  %v2256_v58 = vpop.permute.xlu1 %623 }
  0xd1   :  { %3812 = vst [vmem:[#allocation22_spill] sm:$0xff] %v2254_v57  ;;  %3813 = vst [vmem:[#allocation23_spill] sm:$0xff] %v2256_v58 }
  0xd4   :  { %v659_v59 = vpop.permute.xlu0 %658  ;;  %v662_v60 = vpop.permute.xlu1 %661 }
  0xd5   :  { %v660_v61 = vsel %vm181_vm1, %v659_v59, %v1959_v5  ;;  %v663_v62 = vsel %vm181_vm1, %v662_v60, %v1961_v6 }
  0xd6   :  { %706 = vrot.lane.b32.xlu0 %v660_v61, %s1911_s6  ;;  %708 = vrot.lane.b32.xlu1 %v663_v62, %s1911_s6 }
  0xd8   :  { %v665_v63 = vpop.permute.xlu0 %664  ;;  %v668_v0 = vpop.permute.xlu1 %667 }
  0xd9   :  { %v666_v3 = vsel %vm181_vm1, %v665_v63, %v1972_v11  ;;  %v669_v4 = vsel %vm181_vm1, %v668_v0, %v1974_v12 }
  0xda   :  { %710 = vrot.lane.b32.xlu0 %v666_v3, %s1911_s6  ;;  %712 = vrot.lane.b32.xlu1 %v669_v4, %s1911_s6 }
  0xdc   :  { %v671_v15 = vpop.permute.xlu0 %670  ;;  %v674_v16 = vpop.permute.xlu1 %673 }
  0xdd   :  { %v672_v21 = vsel %vm181_vm1, %v671_v15, %v1986_v17  ;;  %v675_v22 = vsel %vm181_vm1, %v674_v16, %v1988_v18 }
  0xde   :  { %714 = vrot.lane.b32.xlu0 %v672_v21, %s1911_s6  ;;  %716 = vrot.lane.b32.xlu1 %v675_v22, %s1911_s6 }
  0xe0   :  { %v677_v27 = vpop.permute.xlu0 %676  ;;  %v680_v28 = vpop.permute.xlu1 %679 }
  0xe1   :  { %v678_v59 = vsel %vm181_vm1, %v677_v27, %v2004_v23  ;;  %v681_v60 = vsel %vm181_vm1, %v680_v28, %v2006_v24 }
  0xe2   :  { %718 = vrot.lane.b32.xlu0 %v678_v59, %s1911_s6  ;;  %720 = vrot.lane.b32.xlu1 %v681_v60, %s1911_s6 }
  0xe4   :  { %v683_v61 = vpop.permute.xlu0 %682  ;;  %v686_v62 = vpop.permute.xlu1 %685 }
  0xe5   :  { %v684_v63 = vsel %vm181_vm1, %v683_v61, %v2022_v29  ;;  %v687_v0 = vsel %vm181_vm1, %v686_v62, %v2024_v30 }
  0xe6   :  { %722 = vrot.lane.b32.xlu0 %v684_v63, %s1911_s6  ;;  %724 = vrot.lane.b32.xlu1 %v687_v0, %s1911_s6 }
  0xe8   :  { %v689_v3 = vpop.permute.xlu0 %688  ;;  %v692_v4 = vpop.permute.xlu1 %691 }
  0xe9   :  { %v690_v15 = vsel %vm181_vm1, %v689_v3, %v2040_v35  ;;  %v693_v16 = vsel %vm181_vm1, %v692_v4, %v2042_v36 }
  0xea   :  { %726 = vrot.lane.b32.xlu0 %v690_v15, %s1911_s6  ;;  %728 = vrot.lane.b32.xlu1 %v693_v16, %s1911_s6 }
  0xec   :  { %v695_v21 = vpop.permute.xlu0 %694  ;;  %v698_v22 = vpop.permute.xlu1 %697 }
  0xed   :  { %v696_v27 = vsel %vm181_vm1, %v695_v21, %v2058_v41  ;;  %v699_v28 = vsel %vm181_vm1, %v698_v22, %v2060_v42 }
  0xee   :  { %730 = vrot.lane.b32.xlu0 %v696_v27, %s1911_s6  ;;  %732 = vrot.lane.b32.xlu1 %v699_v28, %s1911_s6 }
  0xf0   :  { %v701_v59 = vpop.permute.xlu0 %700  ;;  %v704_v60 = vpop.permute.xlu1 %703 }
  0xf1   :  { %v702_v61 = vsel %vm181_vm1, %v701_v59, %v2076_v47  ;;  %v705_v62 = vsel %vm181_vm1, %v704_v60, %v2078_v48 }
  0xf2   :  { %734 = vrot.lane.b32.xlu0 %v702_v61, %s1911_s6  ;;  %736 = vrot.lane.b32.xlu1 %v705_v62, %s1911_s6 }
 0x110   :  { %v231_v63 = vpop.permute.xlu0 %230  ;;  %v233_v0 = vpop.permute.xlu1 %232 }
 0x111   :  { %v263_v7 = vsel %vm181_vm1, %v233_v0, %v1982_v14 }
 0x114   :  { %v235_v3 = vpop.permute.xlu0 %234  ;;  %v237_v4 = vpop.permute.xlu1 %236 }
 0x118   :  { %v239_v15 = vpop.permute.xlu0 %238  ;;  %v241_v16 = vpop.permute.xlu1 %240 }
 0x119   :  { %v267_v0 = vsel %vm181_vm1, %v241_v16, %v2018_v26 }
 0x11c   :  { %v243_v21 = vpop.permute.xlu0 %242  ;;  %v245_v22 = vpop.permute.xlu1 %244 }
 0x120   :  { %v247_v27 = vpop.permute.xlu0 %246  ;;  %v249_v28 = vpop.permute.xlu1 %248 }
 0x121   :  { %v271_v16 = vsel %vm181_vm1, %v249_v28, %v2054_v38 }
 0x124   :  { %v251_v1 = vpop.permute.xlu0 %250  ;;  %v253_v58 = vpop.permute.xlu1 %252 }
 0x128   :  { %v255_v59 = vpop.permute.xlu0 %254  ;;  %v257_v57 = vpop.permute.xlu1 %256 }
 0x129   :  { %v275_v28 = vsel %vm181_vm1, %v257_v57, %v2090_v50 }
 0x12c   :  { %v259_v56 = vpop.permute.xlu0 %258  ;;  %v261_v60 = vpop.permute.xlu1 %260 }
 0x148   :  { %v707_v55 = vpop.permute.xlu0 %706  ;;  %v709_v61 = vpop.permute.xlu1 %708 }
 0x149   :  { %v2308_v62 = vsel %vm181_vm1, %v707_v55, %v1959_v5  ;;  %v2312_v40 = vsel %vm181_vm1, %v709_v61, %v1961_v6 }
 0x14a   :  { %772 = vrot.lane.b32.xlu0 %v2308_v62, %s1912_s5  ;;  %774 = vrot.lane.b32.xlu1 %v2312_v40, %s1912_s5 }
 0x14c   :  { %v711_v39 = vpop.permute.xlu0 %710  ;;  %v713_v52 = vpop.permute.xlu1 %712 }
 0x14d   :  { %v2320_v34 = vsel %vm181_vm1, %v711_v39, %v1972_v11  ;;  %v2324_v55 = vsel %vm181_vm1, %v713_v52, %v1974_v12 }
 0x14e   :  { %776 = vrot.lane.b32.xlu0 %v2320_v34, %s1912_s5  ;;  %778 = vrot.lane.b32.xlu1 %v2324_v55, %s1912_s5 }
 0x150   :  { %v715_v61 = vpop.permute.xlu0 %714  ;;  %v717_v51 = vpop.permute.xlu1 %716 }
 0x151   :  { %v2332_v33 = vsel %vm181_vm1, %v715_v61, %v1986_v17  ;;  %v2336_v39 = vsel %vm181_vm1, %v717_v51, %v1988_v18 }
 0x152   :  { %780 = vrot.lane.b32.xlu0 %v2332_v33, %s1912_s5  ;;  %782 = vrot.lane.b32.xlu1 %v2336_v39, %s1912_s5 }
 0x154   :  { %v719_v52 = vpop.permute.xlu0 %718  ;;  %v721_v46 = vpop.permute.xlu1 %720 }
 0x155   :  { %v2344_v45 = vsel %vm181_vm1, %v719_v52, %v2004_v23  ;;  %v2348_v61 = vsel %vm181_vm1, %v721_v46, %v2006_v24  ;;  %v262_v46 = vsel %vm181_vm1, %v231_v63, %v1978_v13  ;;  %v266_v63 = vsel %vm181_vm1, %v239_v15, %v2014_v25 }
 0x156   :  { %784 = vrot.lane.b32.xlu0 %v2344_v45, %s1912_s5  ;;  %786 = vrot.lane.b32.xlu1 %v2348_v61, %s1912_s5  ;;  %v270_v15 = vsel %vm181_vm1, %v247_v27, %v2050_v37  ;;  %v274_v27 = vsel %vm181_vm1, %v255_v59, %v2086_v49 }
 0x158   :  { %v723_v51 = vpop.permute.xlu0 %722  ;;  %v725_v9 = vpop.permute.xlu1 %724 }
 0x159   :  { %v2356_v10 = vsel %vm181_vm1, %v723_v51, %v2022_v29  ;;  %v2360_v52 = vsel %vm181_vm1, %v725_v9, %v2024_v30  ;;  %v264_v9 = vsel %vm181_vm1, %v235_v3, %v1996_v19  ;;  %v265_v51 = vsel %vm181_vm1, %v237_v4, %v2000_v20 }
 0x15a   :  { %788 = vrot.lane.b32.xlu0 %v2356_v10, %s1912_s5  ;;  %790 = vrot.lane.b32.xlu1 %v2360_v52, %s1912_s5  ;;  %v268_v3 = vsel %vm181_vm1, %v243_v21, %v2032_v31  ;;  %v269_v4 = vsel %vm181_vm1, %v245_v22, %v2036_v32  ;;  %v272_v21 = vsel %vm181_vm1, %v251_v1, %v2068_v43 }
 0x15b   :  { %v273_v22 = vsel %vm181_vm1, %v253_v58, %v2072_v44  ;;  %v276_v1 = vsel %vm181_vm1, %v259_v56, %v2100_v53  ;;  %v277_v58 = vsel %vm181_vm1, %v261_v60, %v2104_v54 }
 0x15c   :  { %v729_v56 = vpop.permute.xlu1 %728 }
 0x15e   :  { %300 = vrot.lane.b32.xlu0 %v262_v46, %s1912_s5  ;;  %302 = vrot.lane.b32.xlu1 %v263_v7, %s1912_s5 }
 0x160   :  { %v733_v59 = vpop.permute.xlu1 %732 }
 0x162   :  { %304 = vrot.lane.b32.xlu0 %v264_v9, %s1912_s5  ;;  %306 = vrot.lane.b32.xlu1 %v265_v51, %s1912_s5 }
 0x166   :  { %308 = vrot.lane.b32.xlu0 %v266_v63, %s1912_s5  ;;  %310 = vrot.lane.b32.xlu1 %v267_v0, %s1912_s5 }
 0x16a   :  { %312 = vrot.lane.b32.xlu0 %v268_v3, %s1912_s5  ;;  %314 = vrot.lane.b32.xlu1 %v269_v4, %s1912_s5 }
 0x16e   :  { %316 = vrot.lane.b32.xlu0 %v270_v15, %s1912_s5  ;;  %318 = vrot.lane.b32.xlu1 %v271_v16, %s1912_s5 }
 0x172   :  { %320 = vrot.lane.b32.xlu0 %v272_v21, %s1912_s5  ;;  %322 = vrot.lane.b32.xlu1 %v273_v22, %s1912_s5 }
 0x176   :  { %324 = vrot.lane.b32.xlu0 %v274_v27, %s1912_s5  ;;  %326 = vrot.lane.b32.xlu1 %v275_v28, %s1912_s5 }
 0x17a   :  { %328 = vrot.lane.b32.xlu0 %v276_v1, %s1912_s5  ;;  %330 = vrot.lane.b32.xlu1 %v277_v58, %s1912_s5 }
 0x17e   :  { %526 = vrot.lane.b32.xlu0 %v262_v46, %s1913_s7  ;;  %528 = vrot.lane.b32.xlu1 %v263_v7, %s1913_s7  ;;  %v727_v7 = vpop.permute.xlu0 %726  ;;  %v749_v46 = vsel %vm181_vm1, %v729_v56, %v2042_v36  ;;  %v1040_v56 = vrot.slane %v1986_v17, 1 }
 0x17f   :  { %v748_v60 = vsel %vm181_vm1, %v727_v7, %v2040_v35 }
 0x182   :  { %530 = vrot.lane.b32.xlu0 %v264_v9, %s1913_s7  ;;  %532 = vrot.lane.b32.xlu1 %v265_v51, %s1913_s7  ;;  %v731_v57 = vpop.permute.xlu0 %730  ;;  %v2440_v51 = vsel %vm181_vm1, %v733_v59, %v2060_v42 }
 0x183   :  { %v750_v9 = vsel %vm181_vm1, %v731_v57, %v2058_v41  ;;  %v1048_v57 = vrot.slane %v1988_v18, 1 }
 0x186   :  { %534 = vrot.lane.b32.xlu0 %v266_v63, %s1913_s7  ;;  %536 = vrot.lane.b32.xlu1 %v267_v0, %s1913_s7  ;;  %v735_v63 = vpop.permute.xlu0 %734  ;;  %v737_v0 = vpop.permute.xlu1 %736 }
 0x18a   :  { %538 = vrot.lane.b32.xlu0 %v268_v3, %s1913_s7  ;;  %540 = vrot.lane.b32.xlu1 %v269_v4, %s1913_s7  ;;  %v2447_v3 = vsel %vm181_vm1, %v735_v63, %v2076_v47  ;;  %v2451_v4 = vsel %vm181_vm1, %v737_v0, %v2078_v48  ;;  %v1041_v63 = vrot.slane %v2004_v23, 1  ;;  %v1049_v0 = vrot.slane %v2006_v24, 1 }
 0x18e   :  { %542 = vrot.lane.b32.xlu0 %v270_v15, %s1913_s7  ;;  %544 = vrot.lane.b32.xlu1 %v271_v16, %s1913_s7  ;;  %v1745_v15 = vld [vmem:[%s3742_s1 + $0xc] ss:$0 sm:$0xff]  ;;  %v1746_v16 = vld [vmem:[%s3742_s1 + $0xd] ss:$0 sm:$0xff] }
 0x192   :  { %546 = vrot.lane.b32.xlu0 %v272_v21, %s1913_s7  ;;  %548 = vrot.lane.b32.xlu1 %v273_v22, %s1913_s7  ;;  %v1747_v21 = vld [vmem:[%s3742_s1 + $0xe] ss:$0 sm:$0xff]  ;;  %v1748_v22 = vld [vmem:[%s3742_s1 + $0xf] ss:$0 sm:$0xff] }
 0x196   :  { %550 = vrot.lane.b32.xlu0 %v274_v27, %s1913_s7  ;;  %552 = vrot.lane.b32.xlu1 %v275_v28, %s1913_s7 }
 0x19a   :  { %554 = vrot.lane.b32.xlu0 %v276_v1, %s1913_s7  ;;  %556 = vrot.lane.b32.xlu1 %v277_v58, %s1913_s7 }
 0x19e   :  { %792 = vrot.lane.b32.xlu0 %v748_v60, %s1912_s5  ;;  %794 = vrot.lane.b32.xlu1 %v749_v46, %s1912_s5 }
 0x1a2   :  { %796 = vrot.lane.b32.xlu0 %v750_v9, %s1912_s5  ;;  %798 = vrot.lane.b32.xlu1 %v2440_v51, %s1912_s5 }
 0x1a6   :  { %800 = vrot.lane.b32.xlu0 %v2447_v3, %s1912_s5  ;;  %802 = vrot.lane.b32.xlu1 %v2451_v4, %s1912_s5 }
 0x1aa   :  { %857 = vperm.xlu0 %1793, %v1745_v15   ;;  %861 = vperm.xlu1 %1794, %v1746_v16  }
 0x1ae   :  { %865 = vperm.xlu0 %1793, %v1747_v21   ;;  %869 = vperm.xlu1 %1794, %v1748_v22   ;;  %v2557_v21 = vsel %vm1054_vm2, %v1048_v57, %v1040_v56  ;;  %v2561_v22 = vsel %vm1054_vm2, %v1041_v63, %v1049_v0 }
 0x1af   :  { %3822 = vst [vmem:[#allocation32_spill] sm:$0xff] %v2557_v21  ;;  %3823 = vst [vmem:[#allocation33_spill] sm:$0xff] %v2561_v22 }
 0x1b2   :  { %906 = vrot.lane.b32.xlu0 %v2308_v62, %s1913_s7  ;;  %908 = vrot.lane.b32.xlu1 %v2312_v40, %s1913_s7  ;;  %v1046_v62 = vrot.slane %v1961_v6, 1 }
 0x1b6   :  { %910 = vrot.lane.b32.xlu0 %v2320_v34, %s1913_s7  ;;  %912 = vrot.lane.b32.xlu1 %v2324_v55, %s1913_s7 }
 0x1ba   :  { %914 = vrot.lane.b32.xlu0 %v2332_v33, %s1913_s7  ;;  %916 = vrot.lane.b32.xlu1 %v2336_v39, %s1913_s7  ;;  %v1038_v33 = vrot.slane %v1959_v5, 1  ;;  %v1039_v39 = vrot.slane %v1972_v11, 1 }
 0x1bc   :  { %v2481_v27 = vpop.permute.xlu0 %772  ;;  %v2483_v28 = vpop.permute.xlu1 %774  ;;  %v2521_v58 = vsel %vm1054_vm2, %v1046_v62, %v1038_v33 }
 0x1bd   :  { %3816 = vst [vmem:[#allocation26_spill] sm:$0xff] %v2521_v58 }
 0x1be   :  { %918 = vrot.lane.b32.xlu0 %v2344_v45, %s1913_s7  ;;  %920 = vrot.lane.b32.xlu1 %v2348_v61, %s1913_s7  ;;  %v1047_v61 = vrot.slane %v1974_v12, 1 }
 0x1c0   :  { %v2489_v34 = vpop.permute.xlu0 %776  ;;  %v2491_v40 = vpop.permute.xlu1 %778  ;;  %v2525_v7 = vsel %vm1054_vm2, %v1039_v39, %v1047_v61 }
 0x1c1   :  { %3817 = vst [vmem:[#allocation27_spill] sm:$0xff] %v2525_v7 }
 0x1c2   :  { %922 = vrot.lane.b32.xlu0 %v2356_v10, %s1913_s7  ;;  %924 = vrot.lane.b32.xlu1 %v2360_v52, %s1913_s7  ;;  %v2508_v10 = vsel %vm1054_vm2, %v1038_v33, %v1046_v62  ;;  %v1042_v33 = vrot.slane %v2022_v29, 1  ;;  %v1050_v62 = vrot.slane %v2024_v30, 1 }
 0x1c3   :  { %3814 = vst [vmem:[#allocation24_spill] sm:$0xff] %v2508_v10 }
 0x1c4   :  { %v2499_v55 = vpop.permute.xlu0 %780  ;;  %v2501_v45 = vpop.permute.xlu1 %782 }
 0x1c6   :  { %926 = vrot.lane.b32.xlu0 %v748_v60, %s1913_s7  ;;  %928 = vrot.lane.b32.xlu1 %v749_v46, %s1913_s7  ;;  %v2539_v46 = vsel %vm1054_vm2, %v1047_v61, %v1039_v39 }
 0x1c7   :  { %3820 = vst [vmem:[#allocation30_spill] sm:$0xff] %v2539_v46 }
 0x1c8   :  { %v2512_v52 = vpop.permute.xlu0 %784  ;;  %v2514_v1 = vpop.permute.xlu1 %786 }
 0x1c9   :  { %3815 = vst [vmem:[#allocation25_spill] sm:$0xff] %v2514_v1 }
 0x1ca   :  { %930 = vrot.lane.b32.xlu0 %v750_v9, %s1913_s7  ;;  %1071 = vrot.lane.b32.xlu1 %v2508_v10, %s1911_s6  ;;  %v2543_v9 = vsel %vm1054_vm2, %v1040_v56, %v1048_v57  ;;  %v2575_v56 = vsel %vm1054_vm2, %v1049_v0, %v1041_v63  ;;  %v2579_v57 = vsel %vm1054_vm2, %v1042_v33, %v1050_v62 }
 0x1cb   :  { %3821 = vst [vmem:[#allocation31_spill] sm:$0xff] %v2543_v9  ;;  %3824 = vst [vmem:[#allocation34_spill] sm:$0xff] %v2575_v56  ;;  %v2593_v63 = vsel %vm1054_vm2, %v1050_v62, %v1042_v33 }
 0x1cc   :  { %v2529_v59 = vpop.permute.xlu0 %788  ;;  %v2531_v60 = vpop.permute.xlu1 %790  ;;  %3825 = vst [vmem:[#allocation35_spill] sm:$0xff] %v2579_v57  ;;  %3826 = vst [vmem:[#allocation36_spill] sm:$0xff] %v2593_v63 }
 0x1cd   :  { %3818 = vst [vmem:[#allocation28_spill] sm:$0xff] %v2529_v59  ;;  %3819 = vst [vmem:[#allocation29_spill] sm:$0xff] %v2531_v60  ;;  %v1043_v60 = vrot.slane %v2040_v35, 1  ;;  %v1051_v59 = vrot.slane %v2042_v36, 1 }
 0x1ce   :  { %1074 = vrot.lane.b32.xlu0 %v2521_v58, %s1911_s6  ;;  %1077 = vrot.lane.b32.xlu1 %v2525_v7, %s1911_s6 }
 0x1cf   :  { %v2597_v0 = vsel %vm1054_vm2, %v1043_v60, %v1051_v59  ;;  %v2611_v33 = vsel %vm1054_vm2, %v1051_v59, %v1043_v60 }
 0x1d0   :  { %v2547_v15 = vpop.permute.xlu0 %300  ;;  %v2549_v16 = vpop.permute.xlu1 %302  ;;  %3827 = vst [vmem:[#allocation37_spill] sm:$0xff] %v2597_v0  ;;  %3829 = vst [vmem:[#allocation39_spill] sm:$0xff] %v2611_v33 }
 0x1d2   :  { %1080 = vrot.lane.b32.xlu0 %v2539_v46, %s1911_s6  ;;  %1083 = vrot.lane.b32.xlu1 %v2543_v9, %s1911_s6 }
 0x1d4   :  { %v2565_v39 = vpop.permute.xlu0 %304  ;;  %v2567_v61 = vpop.permute.xlu1 %306 }
 0x1d6   :  { %1086 = vrot.lane.b32.xlu0 %v2557_v21, %s1911_s6  ;;  %1089 = vrot.lane.b32.xlu1 %v2561_v22, %s1911_s6  ;;  %v1044_v22 = vrot.slane %v2058_v41, 1  ;;  %v1052_v21 = vrot.slane %v2060_v42, 1 }
 0x1d8   :  { %v2583_v1 = vpop.permute.xlu0 %308  ;;  %v2585_v9 = vpop.permute.xlu1 %310  ;;  %v2615_v62 = vsel %vm1054_vm2, %v1044_v22, %v1052_v21  ;;  %v2629_v59 = vsel %vm1054_vm2, %v1052_v21, %v1044_v22 }
 0x1d9   :  { %3830 = vst [vmem:[#allocation40_spill] sm:$0xff] %v2615_v62  ;;  %3831 = vst [vmem:[#allocation41_spill] sm:$0xff] %v2629_v59 }
 0x1da   :  { %1092 = vrot.lane.b32.xlu0 %v2575_v56, %s1911_s6  ;;  %1095 = vrot.lane.b32.xlu1 %v2579_v57, %s1911_s6  ;;  %v1045_v57 = vrot.slane %v2076_v47, 1  ;;  %v1053_v56 = vrot.slane %v2078_v48, 1 }
 0x1dc   :  { %v2601_v46 = vpop.permute.xlu0 %312  ;;  %v2603_v7 = vpop.permute.xlu1 %314  ;;  %v2633_v60 = vsel %vm1054_vm2, %v1045_v57, %v1053_v56 }
 0x1dd   :  { %3828 = vst [vmem:[#allocation38_spill] sm:$0xff] %v2603_v7  ;;  %3832 = vst [vmem:[#allocation42_spill] sm:$0xff] %v2633_v60 }
 0x1de   :  { %1098 = vrot.lane.b32.xlu0 %v2593_v63, %s1911_s6  ;;  %1101 = vrot.lane.b32.xlu1 %v2597_v0, %s1911_s6 }
 0x1e0   :  { %v2619_v58 = vpop.permute.xlu0 %316  ;;  %v2621_v7 = vpop.permute.xlu1 %318 }
 0x1e2   :  { %1104 = vrot.lane.b32.xlu0 %v2611_v33, %s1911_s6  ;;  %1107 = vrot.lane.b32.xlu1 %v2615_v62, %s1911_s6  ;;  %v2645_v62 = vsel %vm1054_vm2, %v1053_v56, %v1045_v57  ;;  %v1749_v56 = vld [vmem:[%s3742_s1 + $0x14] ss:$0 sm:$0xff]  ;;  %v1750_v57 = vld [vmem:[%s3742_s1 + $0x15] ss:$0 sm:$0xff] }
 0x1e3   :  { %3834 = vst [vmem:[#allocation44_spill] sm:$0xff] %v2645_v62 }
 0x1e4   :  { %v2635_v0 = vpop.permute.xlu0 %320  ;;  %v2637_v63 = vpop.permute.xlu1 %322 }
 0x1e5   :  { %3833 = vst [vmem:[#allocation43_spill] sm:$0xff] %v2637_v63 }
 0x1e6   :  { %1110 = vrot.lane.b32.xlu0 %v2629_v59, %s1911_s6  ;;  %1113 = vrot.lane.b32.xlu1 %v2633_v60, %s1911_s6 }
 0x1e8   :  { %v2647_v21 = vpop.permute.xlu0 %324  ;;  %v2649_v22 = vpop.permute.xlu1 %326 }
 0x1e9   :  { %3835 = vst [vmem:[#allocation45_spill] sm:$0xff] %v2647_v21  ;;  %3836 = vst [vmem:[#allocation46_spill] sm:$0xff] %v2649_v22 }
 0x1ea   :  { %1116 = vrot.lane.b32.xlu0 %v2645_v62, %s1911_s6  ;;  %932 = vrot.lane.b32.xlu1 %v2440_v51, %s1913_s7 }
 0x1ec   :  { %v2655_v33 = vpop.permute.xlu0 %328  ;;  %v2657_v59 = vpop.permute.xlu1 %330 }
 0x1ed   :  { %3837 = vst [vmem:[#allocation47_spill] sm:$0xff] %v2655_v33  ;;  %3838 = vst [vmem:[#allocation48_spill] sm:$0xff] %v2657_v59 }
 0x1ee   :  { %934 = vrot.lane.b32.xlu0 %v2447_v3, %s1913_s7  ;;  %936 = vrot.lane.b32.xlu1 %v2451_v4, %s1913_s7  ;;  %v1751_v3 = vld [vmem:[%s3742_s1 + $0x16] ss:$0 sm:$0xff]  ;;  %v1752_v4 = vld [vmem:[%s3742_s1 + $0x17] ss:$0 sm:$0xff] }
 0x1f0   :  { %v2669_v62 = vpop.permute.xlu0 %526  ;;  %v2671_v51 = vpop.permute.xlu1 %528 }
 0x1f1   :  { %3839 = vst [vmem:[#allocation49_spill] sm:$0xff] %v2669_v62  ;;  %3840 = vst [vmem:[#allocation50_spill] sm:$0xff] %v2671_v51 }
 0x1f2   :  { %991 = vperm.xlu0 %1793, %v1749_v56   ;;  %995 = vperm.xlu1 %1794, %v1750_v57  }
 0x1f4   :  { %v2679_v60 = vpop.permute.xlu0 %530  ;;  %v2681_v59 = vpop.permute.xlu1 %532 }
 0x1f5   :  { %3841 = vst [vmem:[#allocation51_spill] sm:$0xff] %v2679_v60  ;;  %3842 = vst [vmem:[#allocation52_spill] sm:$0xff] %v2681_v59 }
 0x1f6   :  { %999 = vperm.xlu0 %1793, %v1751_v3   ;;  %1003 = vperm.xlu1 %1794, %v1752_v4  }
 0x1f8   :  { %v2683_v33 = vpop.permute.xlu0 %534  ;;  %v2685_v62 = vpop.permute.xlu1 %536 }
 0x1f9   :  { %3843 = vst [vmem:[#allocation53_spill] sm:$0xff] %v2683_v33  ;;  %3844 = vst [vmem:[#allocation54_spill] sm:$0xff] %v2685_v62 }
 0x1fc   :  { %v2687_v56 = vpop.permute.xlu0 %538  ;;  %v2689_v57 = vpop.permute.xlu1 %540 }
 0x1fd   :  { %3845 = vst [vmem:[#allocation55_spill] sm:$0xff] %v2687_v56  ;;  %3846 = vst [vmem:[#allocation56_spill] sm:$0xff] %v2689_v57 }
 0x200   :  { %v2691_v51 = vpop.permute.xlu0 %542  ;;  %v2693_v22 = vpop.permute.xlu1 %544 }
 0x201   :  { %3847 = vst [vmem:[#allocation57_spill] sm:$0xff] %v2691_v51  ;;  %3848 = vst [vmem:[#allocation58_spill] sm:$0xff] %v2693_v22 }
 0x204   :  { %v2695_v21 = vpop.permute.xlu0 %546  ;;  %v2697_v63 = vpop.permute.xlu1 %548 }
 0x205   :  { %3849 = vst [vmem:[#allocation59_spill] sm:$0xff] %v2695_v21  ;;  %3850 = vst [vmem:[#allocation60_spill] sm:$0xff] %v2697_v63 }
 0x208   :  { %v2699_v60 = vpop.permute.xlu0 %550  ;;  %v2701_v3 = vpop.permute.xlu1 %552 }
 0x209   :  { %3851 = vst [vmem:[#allocation61_spill] sm:$0xff] %v2699_v60  ;;  %3852 = vst [vmem:[#allocation62_spill] sm:$0xff] %v2701_v3 }
 0x20c   :  { %v2703_v4 = vpop.permute.xlu0 %554  ;;  %v2705_v33 = vpop.permute.xlu1 %556 }
 0x20d   :  { %3853 = vst [vmem:[#allocation63_spill] sm:$0xff] %v2703_v4  ;;  %3854 = vst [vmem:[#allocation64_spill] sm:$0xff] %v2705_v33 }
 0x210   :  { %v2707_v62 = vpop.permute.xlu0 %792  ;;  %v2709_v56 = vpop.permute.xlu1 %794 }
 0x211   :  { %3855 = vst [vmem:[#allocation65_spill] sm:$0xff] %v2707_v62  ;;  %3856 = vst [vmem:[#allocation66_spill] sm:$0xff] %v2709_v56  ;;  %v3867_v56 = vlaneseq }
 0x214   :  { %v2711_v57 = vpop.permute.xlu0 %796  ;;  %v2713_v51 = vpop.permute.xlu1 %798  ;;  %v3932_v2 = vld [vmem:[#allocation64_spill] sm:$0xff] }
 0x215   :  { %3857 = vst [vmem:[#allocation67_spill] sm:$0xff] %v2711_v57  ;;  %3858 = vst [vmem:[#allocation68_spill] sm:$0xff] %v2713_v51  ;;  %v2732_v57 = vand.u32 127, %v3867_v56  ;;  %v436_v56 = vsel %vm90_vm3, %v1978_v13, 0.0  ;;  %v446_v13 = vsel %vm90_vm3, %v2068_v43, 0.0  ;;  %v132_v43 = vmul.f32 %v2180_v8, %v1959_v5 }
 0x216   :  { %v2799_v5 = vmul.f32 %v2180_v8, %v2022_v29  ;;  %v3876_v29 = vld [vmem:[#allocation10_spill] sm:$0xff] }
 0x217   :  { %vm95_vm4 = vcmp.lt.s32.totalorder %v2732_v57, 15  ;;  %vm94_vm5 = vcmp.ge.s32.totalorder %v2732_v57, 1 }
 0x218   :  { %v2715_v22 = vpop.permute.xlu0 %800  ;;  %v2717_v21 = vpop.permute.xlu1 %802  ;;  %vm2793_vm6 = vmand %vm90_vm3, %vm94_vm5 }
 0x219   :  { %3859 = vst [vmem:[#allocation69_spill] sm:$0xff] %v2715_v22  ;;  %3860 = vst [vmem:[#allocation70_spill] sm:$0xff] %v2717_v21  ;;  %v348_v59 = vsel %vm2793_vm6, %v2547_v15, 0.0  ;;  %v350_v15 = vsel %vm2793_vm6, %v2565_v39, 0.0  ;;  %v3882_v39 = vld [vmem:[#allocation12_spill] sm:$0xff] }
 0x21a   :  { %vm3038_vm7 = vmand %vm90_vm3, %vm95_vm4 }
 0x229   :  { %v2719_v63 = vpop.permute.xlu0 %857  ;;  %v2721_v60 = vpop.permute.xlu1 %861 }
 0x22a   :  { %3861 = vst [vmem:[#allocation71_spill] sm:$0xff] %v2719_v63  ;;  %3862 = vst [vmem:[#allocation72_spill] sm:$0xff] %v2721_v60  ;;  %v2821_v63 = vmul.f32 %v3876_v29, %v2004_v23 }
 0x22d   :  { %v2723_v3 = vpop.permute.xlu0 %865  ;;  %v2725_v4 = vpop.permute.xlu1 %869 }
 0x22e   :  { %3863 = vst [vmem:[#allocation73_spill] sm:$0xff] %v2723_v3  ;;  %3864 = vst [vmem:[#allocation74_spill] sm:$0xff] %v2725_v4  ;;  %v133_v3 = vmul.f32 %v2180_v8, %v1961_v6  ;;  %v2803_v6 = vmul.f32 %v2180_v8, %v2024_v30  ;;  %v2825_v30 = vmul.f32 %v3876_v29, %v2006_v24  ;;  %v3879_v24 = vld [vmem:[#allocation16_spill] sm:$0xff] }
 0x231   :  { %v2727_v33 = vpop.permute.xlu0 %906  ;;  %v2729_v62 = vpop.permute.xlu1 %908 }
 0x232   :  { %3865 = vst [vmem:[#allocation75_spill] sm:$0xff] %v2727_v33  ;;  %3866 = vst [vmem:[#allocation76_spill] sm:$0xff] %v2729_v62  ;;  %v438_v62 = vsel %vm90_vm3, %v1996_v19, 0.0  ;;  %v440_v33 = vsel %vm90_vm3, %v2014_v25, 0.0  ;;  %v448_v19 = vsel %vm90_vm3, %v2086_v49, 0.0  ;;  %v450_v25 = vsel %vm90_vm3, %v2100_v53, 0.0 }
 0x233   :  { %v3872_v49 = vld [vmem:[#allocation9_spill] sm:$0xff] }
 0x234   :  { %v2783_v51 = vmul.f32 %v3872_v49, %v1986_v17  ;;  %v2787_v53 = vmul.f32 %v3872_v49, %v1988_v18  ;;  %v2807_v17 = vmul.f32 %v3872_v49, %v2058_v41  ;;  %v2811_v18 = vmul.f32 %v3872_v49, %v2060_v42 }
 0x235   :  { %v911_v21 = vpop.permute.xlu0 %910  ;;  %v913_v22 = vpop.permute.xlu1 %912  ;;  %v488_v49 = vmul.f32 %v3879_v24, %v436_v56  ;;  %v349_v56 = vsel %vm94_vm5, %v2549_v16, 0.0 }
 0x236   :  { %v2738_v60 = vsel %vm95_vm4, %v911_v21, 0.0  ;;  %v2742_v4 = vsel %vm95_vm4, %v913_v22, 0.0  ;;  %v442_v21 = vsel %vm90_vm3, %v2032_v31, 0.0  ;;  %v444_v22 = vsel %vm90_vm3, %v2050_v37, 0.0 }
 0x237   :  { %3868 = vst [vmem:[#allocation77_spill] sm:$0xff] %v2738_v60  ;;  %3869 = vst [vmem:[#allocation78_spill] sm:$0xff] %v2742_v4 }
 0x239   :  { %v915_v4 = vpop.permute.xlu0 %914  ;;  %v917_v60 = vpop.permute.xlu1 %916 }
 0x23a   :  { %v2771_v31 = vsel %vm95_vm4, %v915_v4, 0.0  ;;  %v2775_v37 = vsel %vm95_vm4, %v917_v60, 0.0  ;;  %v3875_v4 = vld [vmem:[#allocation11_spill] sm:$0xff] }
 0x23b   :  { %3870 = vst [vmem:[#allocation79_spill] sm:$0xff] %v2771_v31  ;;  %3871 = vst [vmem:[#allocation80_spill] sm:$0xff] %v2775_v37  ;;  %v134_v37 = vmul.f32 %v3875_v4, %v1972_v11  ;;  %v2817_v31 = vmul.f32 %v3875_v4, %v1974_v12  ;;  %v2829_v42 = vmul.f32 %v3875_v4, %v2040_v35 }
 0x23c   :  { %v2833_v11 = vmul.f32 %v3875_v4, %v2042_v36  ;;  %v2849_v35 = vmul.f32 %v3876_v29, %v2076_v47  ;;  %v2853_v36 = vmul.f32 %v3876_v29, %v2078_v48  ;;  %v489_v4 = vmul.f32 %v3879_v24, %v1982_v14  ;;  %v3880_v48 = vld [vmem:[#allocation17_spill] sm:$0xff] }
 0x23d   :  { %v919_v41 = vpop.permute.xlu0 %918  ;;  %v921_v8 = vpop.permute.xlu1 %920  ;;  %v2868_v47 = vmul.f32 %v3879_v24, %v2054_v38  ;;  %v490_v29 = vmul.f32 %v3880_v48, %v438_v62  ;;  %v2873_v14 = vmul.f32 %v3880_v48, %v2000_v20  ;;  %v2880_v16 = vmul.f32 %v3880_v48, %v2072_v44  ;;  %v3885_v20 = vld [vmem:[#allocation18_spill] sm:$0xff] }
 0x23e   :  { %v2837_v12 = vsel %vm95_vm4, %v919_v41, 0.0  ;;  %v2841_v23 = vsel %vm95_vm4, %v921_v8, 0.0  ;;  %v2858_v41 = vmul.f32 %v3879_v24, %v444_v22  ;;  %v2876_v22 = vmul.f32 %v3880_v48, %v446_v13  ;;  %v3886_v48 = vld [vmem:[#allocation13_spill] sm:$0xff] }
 0x23f   :  { %3877 = vst [vmem:[#allocation9_spill] sm:$0xff] %v2837_v12  ;;  %3878 = vst [vmem:[#allocation11_spill] sm:$0xff] %v2841_v23  ;;  %v400_v12 = vmul.f32 %v3882_v39, %v348_v59  ;;  %v2892_v24 = vmul.f32 %v3885_v20, %v440_v33  ;;  %v2896_v13 = vmul.f32 %v3885_v20, %v2018_v26  ;;  %v351_v33 = vsel %vm94_vm5, %v2567_v61, 0.0 }
 0x240   :  { %3881 = vst [vmem:[#allocation10_spill] sm:$0xff] %v2880_v16  ;;  %v401_v44 = vmul.f32 %v3882_v39, %v349_v56  ;;  %v402_v16 = vmul.f32 %v3886_v48, %v350_v15  ;;  %v2901_v59 = vmul.f32 %v3885_v20, %v448_v19  ;;  %v352_v19 = vsel %vm2793_vm6, %v2583_v1, 0.0 }
 0x241   :  { %v923_v8 = vpop.permute.xlu0 %922  ;;  %v925_v23 = vpop.permute.xlu1 %924  ;;  %v2941_v1 = vsel %vm94_vm5, %v2481_v27, 0.0  ;;  %v2957_v27 = vsel %vm94_vm5, %v2489_v34, 0.0  ;;  %v2977_v34 = vsel %vm94_vm5, %v2512_v52, 0.0 }
 0x242   :  { %v2885_v38 = vsel %vm95_vm4, %v923_v8, 0.0  ;;  %v2889_v62 = vsel %vm95_vm4, %v925_v23, 0.0  ;;  %v2905_v8 = vmul.f32 %v3885_v20, %v2090_v50  ;;  %v3887_v23 = vld [vmem:[#allocation19_spill] sm:$0xff]  ;;  %v353_v50 = vsel %vm94_vm5, %v2585_v9, 0.0 }
 0x243   :  { %3883 = vst [vmem:[#allocation16_spill] sm:$0xff] %v2885_v38  ;;  %3884 = vst [vmem:[#allocation17_spill] sm:$0xff] %v2889_v62  ;;  %v2908_v62 = vmul.f32 %v3887_v23, %v442_v21  ;;  %v2915_v26 = vmul.f32 %v3887_v23, %v2036_v32  ;;  %v2918_v56 = vmul.f32 %v3887_v23, %v450_v25 }
 0x244   :  { %v2928_v61 = vmul.f32 %v3887_v23, %v2104_v54  ;;  %v416_v20 = vadd.f32 %v400_v12, %v132_v43  ;;  %v417_v9 = vadd.f32 %v401_v44, %v133_v3  ;;  %v418_v38 = vadd.f32 %v402_v16, %v134_v37  ;;  %v3889_v43 = vld [vmem:[#allocation14_spill] sm:$0xff] }
 0x245   :  { %3888 = vst [vmem:[#allocation12_spill] sm:$0xff] %v2918_v56  ;;  %v927_v21 = vpop.permute.xlu0 %926  ;;  %v929_v15 = vpop.permute.xlu1 %928  ;;  %v403_v56 = vmul.f32 %v3886_v48, %v351_v33  ;;  %v2947_v54 = vsel %vm94_vm5, %v2483_v28, 0.0  ;;  %v404_v12 = vmul.f32 %v3889_v43, %v352_v19  ;;  %v405_v23 = vmul.f32 %v3889_v43, %v353_v50 }
 0x246   :  { %v2932_v32 = vsel %vm95_vm4, %v927_v21, 0.0  ;;  %v2936_v25 = vsel %vm95_vm4, %v929_v15, 0.0  ;;  %v354_v21 = vsel %vm2793_vm6, %v2601_v46, 0.0  ;;  %v2962_v3 = vsel %vm94_vm5, %v2491_v40, 0.0 }
 0x247   :  { %v2967_v28 = vsel %vm94_vm5, %v2499_v55, 0.0  ;;  %v2972_v37 = vsel %vm94_vm5, %v2501_v45, 0.0  ;;  %v2979_v44 = vadd.f32 %v488_v49, %v416_v20  ;;  %v419_v33 = vadd.f32 %v403_v56, %v2817_v31  ;;  %v3891_v45 = vld [vmem:[#allocation15_spill] sm:$0xff]  ;;  %v3892_v20 = vld [vmem:[#allocation38_spill] sm:$0xff] }
 0x248   :  { %v406_v19 = vmul.f32 %v3891_v45, %v354_v21  ;;  %v2989_v50 = vadd.f32 %v489_v4, %v417_v9  ;;  %v2991_v15 = vadd.f32 %v490_v29, %v418_v38  ;;  %v420_v52 = vadd.f32 %v404_v12, %v2783_v51  ;;  %v3893_v38 = vld [vmem:[#allocation43_spill] sm:$0xff] }
 0x249   :  { %v931_v46 = vpop.permute.xlu0 %930  ;;  %v1072_v16 = vpop.permute.xlu1 %1071  ;;  %v421_v49 = vadd.f32 %v405_v23, %v2787_v53  ;;  %v356_v31 = vsel %vm2793_vm6, %v2619_v58, 0.0  ;;  %v357_v4 = vsel %vm94_vm5, %v2621_v7, 0.0  ;;  %v358_v29 = vsel %vm2793_vm6, %v2635_v0, 0.0  ;;  %v3894_v53 = vld [vmem:[#allocation45_spill] sm:$0xff]  ;;  %v3895_v23 = vld [vmem:[#allocation46_spill] sm:$0xff]  ;;  %v3896_v21 = vld [vmem:[#allocation47_spill] sm:$0xff] }
 0x24a   :  { %v2983_v40 = vsel %vm95_vm4, %v931_v46, 0.0  ;;  %v1073_v55 = vsel %vm181_vm1, %v1072_v16, %v2508_v10  ;;  %v355_v46 = vsel %vm94_vm5, %v3892_v20, 0.0  ;;  %v359_v51 = vsel %vm94_vm5, %v3893_v38, 0.0  ;;  %v3897_v16 = vld [vmem:[#allocation26_spill] sm:$0xff] }
 0x24b   :  { %3890 = vst [vmem:[#allocation18_spill] sm:$0xff] %v2983_v40  ;;  %1119 = vrot.lane.b32.xlu0 %v1073_v55, %s1911_s6  ;;  %v360_v56 = vsel %vm2793_vm6, %v3894_v53, 0.0  ;;  %v361_v58 = vsel %vm94_vm5, %v3895_v23, 0.0  ;;  %v362_v7 = vsel %vm2793_vm6, %v3896_v21, 0.0  ;;  %v3898_v55 = vld [vmem:[#allocation27_spill] sm:$0xff]  ;;  %v422_v38 = vadd.f32 %v406_v19, %v2821_v63  ;;  %v3899_v40 = vld [vmem:[#allocation48_spill] sm:$0xff] }
 0x24c   :  { %v407_v53 = vmul.f32 %v3891_v45, %v355_v46  ;;  %v408_v10 = vmul.f32 %v3882_v39, %v356_v31  ;;  %v363_v23 = vsel %vm94_vm5, %v3899_v40, 0.0  ;;  %v409_v60 = vmul.f32 %v3882_v39, %v357_v4 }
 0x24d   :  { %v1075_v9 = vpop.permute.xlu0 %1074  ;;  %v1078_v12 = vpop.permute.xlu1 %1077  ;;  %v3043_v19 = vadd.f32 %v2873_v14, %v419_v33  ;;  %v3046_v40 = vadd.f32 %v2892_v24, %v420_v52  ;;  %v411_v46 = vmul.f32 %v3886_v48, %v359_v51  ;;  %v412_v39 = vmul.f32 %v3889_v43, %v360_v56  ;;  %v3902_v14 = vld [vmem:[#allocation30_spill] sm:$0xff]  ;;  %v3903_v24 = vld [vmem:[#allocation31_spill] sm:$0xff] }
 0x24e   :  { %v1076_v0 = vsel %vm181_vm1, %v1075_v9, %v3897_v16  ;;  %v1079_v20 = vsel %vm181_vm1, %v1078_v12, %v3898_v55  ;;  %v410_v9 = vmul.f32 %v3886_v48, %v358_v29  ;;  %v413_v31 = vmul.f32 %v3889_v43, %v361_v58  ;;  %v3904_v43 = vld [vmem:[#allocation49_spill] sm:$0xff] }
 0x24f   :  { %1121 = vrot.lane.b32.xlu1 %v1076_v0, %s1911_s6  ;;  %1123 = vrot.lane.b32.xlu0 %v1079_v20, %s1911_s6  ;;  %v414_v4 = vmul.f32 %v3891_v45, %v362_v7  ;;  %v415_v21 = vmul.f32 %v3891_v45, %v363_v23  ;;  %v3054_v0 = vadd.f32 %v2896_v13, %v421_v49  ;;  %v574_v56 = vsel %vm3038_vm7, %v3904_v43, 0.0  ;;  %v3905_v49 = vld [vmem:[#allocation50_spill] sm:$0xff]  ;;  %v3907_v23 = vld [vmem:[#allocation20_spill] sm:$0xff] }
 0x250   :  { %v423_v48 = vadd.f32 %v407_v53, %v2825_v30  ;;  %v424_v51 = vadd.f32 %v408_v10, %v2799_v5  ;;  %v3066_v58 = vadd.f32 %v2908_v62, %v422_v38  ;;  %v425_v13 = vadd.f32 %v409_v60, %v2803_v6  ;;  %v3906_v10 = vld [vmem:[#allocation51_spill] sm:$0xff]  ;;  %v3913_v43 = vld [vmem:[#allocation10_spill] sm:$0xff] }
 0x251   :  { %v1081_v29 = vpop.permute.xlu0 %1080  ;;  %v1084_v12 = vpop.permute.xlu1 %1083  ;;  %v426_v45 = vadd.f32 %v410_v9, %v2829_v42  ;;  %v575_v30 = vsel %vm95_vm4, %v3905_v49, 0.0  ;;  %v576_v5 = vsel %vm3038_vm7, %v3906_v10, 0.0  ;;  %v427_v7 = vadd.f32 %v411_v46, %v2833_v11  ;;  %v3908_v9 = vld [vmem:[#allocation32_spill] sm:$0xff]  ;;  %v3911_v11 = vld [vmem:[#allocation21_spill] sm:$0xff] }
 0x252   :  { %v1082_v33 = vsel %vm181_vm1, %v1081_v29, %v3902_v14  ;;  %v1085_v52 = vsel %vm181_vm1, %v1084_v12, %v3903_v24  ;;  %v428_v62 = vadd.f32 %v412_v39, %v2807_v17  ;;  %v429_v20 = vadd.f32 %v413_v31, %v2811_v18  ;;  %v3909_v12 = vld [vmem:[#allocation33_spill] sm:$0xff] }
 0x253   :  { %1125 = vrot.lane.b32.xlu1 %v1082_v33, %s1911_s6  ;;  %1127 = vrot.lane.b32.xlu0 %v1085_v52, %s1911_s6  ;;  %v430_v38 = vadd.f32 %v414_v4, %v2849_v35  ;;  %v431_v42 = vadd.f32 %v415_v21, %v2853_v36  ;;  %v626_v60 = vmul.f32 %v3907_v23, %v574_v56  ;;  %v3910_v52 = vld [vmem:[#allocation25_spill] sm:$0xff]  ;;  %v3912_v36 = vld [vmem:[#allocation52_spill] sm:$0xff] }
 0x254   :  { %v3091_v17 = vsel %vm94_vm5, %v3910_v52, 0.0  ;;  %v627_v18 = vmul.f32 %v3907_v23, %v575_v30  ;;  %v628_v35 = vmul.f32 %v3911_v11, %v576_v5  ;;  %v3096_v46 = vadd.f32 %v2915_v26, %v423_v48  ;;  %v3914_v48 = vld [vmem:[#allocation12_spill] sm:$0xff] }
 0x255   :  { %v1087_v53 = vpop.permute.xlu0 %1086  ;;  %v1090_v6 = vpop.permute.xlu1 %1089  ;;  %v577_v39 = vsel %vm95_vm4, %v3912_v36, 0.0  ;;  %v512_v31 = vadd.f32 %v2858_v41, %v424_v51  ;;  %v513_v4 = vadd.f32 %v2868_v47, %v425_v13  ;;  %v514_v21 = vadd.f32 %v2876_v22, %v426_v45  ;;  %v3915_v51 = vld [vmem:[#allocation34_spill] sm:$0xff]  ;;  %v3916_v22 = vld [vmem:[#allocation35_spill] sm:$0xff]  ;;  %v3917_v45 = vld [vmem:[#allocation28_spill] sm:$0xff] }
 0x256   :  { %v1088_v29 = vsel %vm181_vm1, %v1087_v53, %v3908_v9  ;;  %v1091_v33 = vsel %vm181_vm1, %v1090_v6, %v3909_v12  ;;  %v515_v56 = vadd.f32 %v3913_v43, %v427_v7  ;;  %v516_v49 = vadd.f32 %v2901_v59, %v428_v62  ;;  %v3920_v6 = vld [vmem:[#allocation55_spill] sm:$0xff]  ;;  %v3925_v36 = vld [vmem:[#allocation60_spill] sm:$0xff] }
 0x257   :  { %1129 = vrot.lane.b32.xlu1 %v1088_v29, %s1911_s6  ;;  %1131 = vrot.lane.b32.xlu0 %v1091_v33, %s1911_s6  ;;  %v517_v26 = vadd.f32 %v2905_v8, %v429_v20  ;;  %v3110_v30 = vadd.f32 %v3914_v48, %v430_v38  ;;  %v3113_v53 = vadd.f32 %v626_v60, %v2979_v44  ;;  %v3123_v59 = vsel %vm94_vm5, %v3917_v45, 0.0  ;;  %v3919_v20 = vld [vmem:[#allocation54_spill] sm:$0xff]  ;;  %v3922_v60 = vld [vmem:[#allocation57_spill] sm:$0xff]  ;;  %v3928_v45 = vld [vmem:[#allocation36_spill] sm:$0xff] }
 0x258   :  { %v519_v41 = vadd.f32 %v2928_v61, %v431_v42  ;;  %v3126_v8 = vadd.f32 %v627_v18, %v2989_v50  ;;  %v3129_v7 = vadd.f32 %v628_v35, %v2991_v15  ;;  %v629_v44 = vmul.f32 %v3911_v11, %v577_v39  ;;  %v3918_v61 = vld [vmem:[#allocation53_spill] sm:$0xff]  ;;  %v3921_v15 = vld [vmem:[#allocation56_spill] sm:$0xff]  ;;  %v3923_v33 = vld [vmem:[#allocation58_spill] sm:$0xff] }
 0x259   :  { %v1093_v10 = vpop.permute.xlu0 %1092  ;;  %v1096_v5 = vpop.permute.xlu1 %1095  ;;  %v578_v62 = vsel %vm3038_vm7, %v3918_v61, 0.0  ;;  %v579_v38 = vsel %vm95_vm4, %v3919_v20, 0.0  ;;  %v580_v50 = vsel %vm3038_vm7, %v3920_v6, 0.0  ;;  %v581_v42 = vsel %vm95_vm4, %v3921_v15, 0.0  ;;  %v3924_v18 = vld [vmem:[#allocation59_spill] sm:$0xff]  ;;  %v3929_v20 = vld [vmem:[#allocation37_spill] sm:$0xff] }
 0x25a   :  { %v1094_v47 = vsel %vm181_vm1, %v1093_v10, %v3915_v51  ;;  %v1097_v13 = vsel %vm181_vm1, %v1096_v5, %v3916_v22  ;;  %v582_v29 = vsel %vm3038_vm7, %v3922_v60, 0.0  ;;  %v583_v52 = vsel %vm95_vm4, %v3923_v33, 0.0  ;;  %v3926_v10 = vld [vmem:[#allocation61_spill] sm:$0xff]  ;;  %v3930_v15 = vld [vmem:[#allocation22_spill] sm:$0xff]  ;;  %v3934_v51 = vld [vmem:[#allocation39_spill] sm:$0xff] }
 0x25b   :  { %1133 = vrot.lane.b32.xlu1 %v1094_v47, %s1911_s6  ;;  %1135 = vrot.lane.b32.xlu0 %v1097_v13, %s1911_s6  ;;  %v584_v35 = vsel %vm3038_vm7, %v3924_v18, 0.0  ;;  %v585_v39 = vsel %vm95_vm4, %v3925_v36, 0.0  ;;  %v586_v5 = vsel %vm3038_vm7, %v3926_v10, 0.0  ;;  %v3927_v47 = vld [vmem:[#allocation62_spill] sm:$0xff]  ;;  %v630_v60 = vmul.f32 %v3930_v15, %v578_v62  ;;  %v3931_v18 = vld [vmem:[#allocation63_spill] sm:$0xff] }
 0x25c   :  { %v587_v13 = vsel %vm95_vm4, %v3927_v47, 0.0  ;;  %v631_v33 = vmul.f32 %v3930_v15, %v579_v38  ;;  %v588_v36 = vsel %vm3038_vm7, %v3931_v18, 0.0  ;;  %v589_v10 = vsel %vm95_vm4, %v3932_v2, 0.0 }
 0x25d   :  { %v1099_v43 = vpop.permute.xlu0 %1098  ;;  %v1102_v48 = vpop.permute.xlu1 %1101  ;;  %v634_v62 = vmul.f32 %v3907_v23, %v582_v29  ;;  %v635_v38 = vmul.f32 %v3907_v23, %v583_v52  ;;  %v637_v63 = vmul.f32 %v3911_v11, %v585_v39  ;;  %v638_v18 = vmul.f32 %v3930_v15, %v586_v5  ;;  %v3935_v29 = vld [vmem:[#allocation40_spill] sm:$0xff]  ;;  %v3936_v52 = vld [vmem:[#allocation29_spill] sm:$0xff] }
 0x25e   :  { %v1100_v61 = vsel %vm181_vm1, %v1099_v43, %v3928_v45  ;;  %v1103_v6 = vsel %vm181_vm1, %v1102_v48, %v3929_v20  ;;  %v3933_v43 = vld [vmem:[#allocation23_spill] sm:$0xff]  ;;  %v636_v45 = vmul.f32 %v3911_v11, %v584_v35  ;;  %v639_v2 = vmul.f32 %v3930_v15, %v587_v13 }
 0x25f   :  { %1137 = vrot.lane.b32.xlu1 %v1100_v61, %s1911_s6  ;;  %1139 = vrot.lane.b32.xlu0 %v1103_v6, %s1911_s6  ;;  %v632_v47 = vmul.f32 %v3933_v43, %v580_v50  ;;  %v633_v48 = vmul.f32 %v3933_v43, %v581_v42  ;;  %v640_v6 = vmul.f32 %v3933_v43, %v588_v36  ;;  %v829_v11 = vsel %vm94_vm5, %v3936_v52, 0.0 }
 0x260   :  { %v641_v50 = vmul.f32 %v3933_v43, %v589_v10  ;;  %v645_v35 = vadd.f32 %v629_v44, %v3043_v19  ;;  %v646_v39 = vadd.f32 %v630_v60, %v3046_v40  ;;  %v647_v5 = vadd.f32 %v631_v33, %v3054_v0  ;;  %v3937_v0 = vld [vmem:[#allocation41_spill] sm:$0xff]  ;;  %v3938_v33 = vld [vmem:[#allocation42_spill] sm:$0xff] }
 0x261   :  { %v1105_v20 = vpop.permute.xlu0 %1104  ;;  %v1108_v61 = vpop.permute.xlu1 %1107  ;;  %v648_v13 = vadd.f32 %v632_v47, %v3066_v58  ;;  %v650_v15 = vadd.f32 %v634_v62, %v512_v31  ;;  %v651_v36 = vadd.f32 %v635_v38, %v513_v4  ;;  %v652_v10 = vadd.f32 %v636_v45, %v514_v21  ;;  %v3939_v58 = vld [vmem:[#allocation65_spill] sm:$0xff]  ;;  %v3940_v31 = vld [vmem:[#allocation66_spill] sm:$0xff]  ;;  %v3941_v21 = vld [vmem:[#allocation71_spill] sm:$0xff] }
 0x262   :  { %v1106_v42 = vsel %vm181_vm1, %v1105_v20, %v3934_v51  ;;  %v1109_v23 = vsel %vm181_vm1, %v1108_v61, %v3935_v29  ;;  %v649_v20 = vadd.f32 %v633_v48, %v3096_v46  ;;  %v653_v43 = vadd.f32 %v637_v63, %v515_v56  ;;  %v3944_v45 = vld [vmem:[#allocation69_spill] sm:$0xff]  ;;  %v3946_v38 = vld [vmem:[#allocation72_spill] sm:$0xff] }
 0x263   :  { %1141 = vrot.lane.b32.xlu1 %v1106_v42, %s1911_s6  ;;  %1143 = vrot.lane.b32.xlu0 %v1109_v23, %s1911_s6  ;;  %v654_v61 = vadd.f32 %v638_v18, %v516_v49  ;;  %v655_v52 = vadd.f32 %v639_v2, %v517_v26  ;;  %v656_v40 = vadd.f32 %v640_v6, %v3110_v30  ;;  %v830_v46 = vsel %vm94_vm5, %v3939_v58, 0.0  ;;  %v3942_v26 = vld [vmem:[#allocation67_spill] sm:$0xff] }
 0x264   :  { %v657_v44 = vadd.f32 %v641_v50, %v519_v41  ;;  %v831_v4 = vsel %vm94_vm5, %v3940_v31, 0.0  ;;  %v872_v56 = vmul.f32 %v3941_v21, %v2941_v1  ;;  %v880_v49 = vmul.f32 %v3941_v21, %v3123_v59  ;;  %v3943_v41 = vld [vmem:[#allocation68_spill] sm:$0xff]  ;;  %v3945_v1 = vld [vmem:[#allocation70_spill] sm:$0xff] }
 0x265   :  { %v1111_v51 = vpop.permute.xlu0 %1110  ;;  %v1114_v19 = vpop.permute.xlu1 %1113  ;;  %v832_v30 = vsel %vm94_vm5, %v3942_v26, 0.0  ;;  %v834_v47 = vsel %vm94_vm5, %v3944_v45, 0.0  ;;  %v835_v59 = vsel %vm94_vm5, %v3945_v1, 0.0  ;;  %v873_v48 = vmul.f32 %v3941_v21, %v2947_v54 }
 0x266   :  { %v1112_v60 = vsel %vm181_vm1, %v1111_v51, %v3937_v0  ;;  %v1115_v42 = vsel %vm181_vm1, %v1114_v19, %v3938_v33  ;;  %v833_v51 = vsel %vm94_vm5, %v3943_v41, 0.0  ;;  %v881_v62 = vmul.f32 %v3941_v21, %v829_v11  ;;  %v3947_v19 = vld [vmem:[#allocation44_spill] sm:$0xff]  ;;  %v3948_v11 = vld [vmem:[#allocation73_spill] sm:$0xff] }
 0x267   :  { %1145 = vrot.lane.b32.xlu1 %v1112_v60, %s1911_s6  ;;  %1147 = vrot.lane.b32.xlu0 %v1115_v42, %s1911_s6  ;;  %v874_v63 = vmul.f32 %v3946_v38, %v2957_v27  ;;  %v875_v18 = vmul.f32 %v3946_v38, %v2962_v3  ;;  %v882_v50 = vmul.f32 %v3946_v38, %v830_v46 }
 0x268   :  { %v883_v23 = vmul.f32 %v3946_v38, %v831_v4  ;;  %v876_v42 = vmul.f32 %v3948_v11, %v2967_v28  ;;  %v884_v27 = vmul.f32 %v3948_v11, %v832_v30  ;;  %v896_v58 = vadd.f32 %v880_v49, %v650_v15  ;;  %v3949_v4 = vld [vmem:[#allocation74_spill] sm:$0xff] }
 0x269   :  { %v1117_v2 = vpop.permute.xlu0 %1116  ;;  %v933_v6 = vpop.permute.xlu1 %932  ;;  %v888_v3 = vadd.f32 %v872_v56, %v3113_v53  ;;  %v877_v46 = vmul.f32 %v3948_v11, %v2972_v37  ;;  %v885_v31 = vmul.f32 %v3948_v11, %v833_v51  ;;  %v878_v21 = vmul.f32 %v3949_v4, %v2977_v34 }
 0x26a   :  { %v1118_v60 = vsel %vm181_vm1, %v1117_v2, %v3947_v19  ;;  %v967_v54 = vsel %vm95_vm4, %v933_v6, 0.0  ;;  %v879_v26 = vmul.f32 %v3949_v4, %v3091_v17  ;;  %v886_v28 = vmul.f32 %v3949_v4, %v834_v47 }
 0x26b   :  { %1149 = vrot.lane.b32.xlu1 %v1118_v60, %s1911_s6  ;;  %v887_v30 = vmul.f32 %v3949_v4, %v835_v59  ;;  %v889_v53 = vadd.f32 %v873_v48, %v3126_v8  ;;  %v897_v56 = vadd.f32 %v881_v62, %v651_v36  ;;  %v890_v34 = vadd.f32 %v874_v63, %v3129_v7  ;;  %v3950_v60 = vld [vmem:[#allocation75_spill] sm:$0xff]  ;;  %v3951_v36 = vld [vmem:[#allocation76_spill] sm:$0xff]  ;;  %v3955_v63 = vld [vmem:[#allocation78_spill] sm:$0xff] }
 0x26c   :  { %v891_v51 = vadd.f32 %v875_v18, %v645_v35  ;;  %v898_v45 = vadd.f32 %v882_v50, %v652_v10  ;;  %v899_v17 = vadd.f32 %v883_v23, %v653_v43  ;;  %v892_v1 = vadd.f32 %v876_v42, %v646_v39  ;;  %v3952_v39 = vld [vmem:[#allocation16_spill] sm:$0xff] }
 0x26d   :  { %v935_v15 = vpop.permute.xlu0 %934  ;;  %v937_v49 = vpop.permute.xlu1 %936  ;;  %v900_v47 = vadd.f32 %v884_v27, %v654_v61  ;;  %v893_v38 = vadd.f32 %v877_v46, %v647_v5  ;;  %v894_v59 = vadd.f32 %v878_v21, %v648_v13  ;;  %v895_v2 = vadd.f32 %v879_v26, %v649_v20  ;;  %v3953_v5 = vld [vmem:[#allocation17_spill] sm:$0xff] }
 0x26e   :  { %v968_v37 = vsel %vm95_vm4, %v935_v15, 0.0  ;;  %v969_v41 = vsel %vm95_vm4, %v937_v49, 0.0  ;;  %v901_v6 = vadd.f32 %v885_v31, %v655_v52  ;;  %v954_v8 = vsel %vm95_vm4, %v3950_v60, 0.0  ;;  %v3954_v20 = vld [vmem:[#allocation77_spill] sm:$0xff]  ;;  %v3958_v15 = vld [vmem:[#allocation18_spill] sm:$0xff]  ;;  %v3960_v60 = vld [vmem:[#allocation11_spill] sm:$0xff] }
 0x26f   :  { %v955_v48 = vsel %vm95_vm4, %v3951_v36, 0.0  ;;  %v902_v7 = vadd.f32 %v886_v28, %v656_v40  ;;  %v903_v35 = vadd.f32 %v887_v30, %v657_v44  ;;  %v3956_v28 = vld [vmem:[#allocation79_spill] sm:$0xff] }
 0x271   :  { %v992_v62 = vpop.permute.xlu0 %991  ;;  %v996_v11 = vpop.permute.xlu1 %995 }
 0x272   :  { %v1006_v10 = vmul.f32 %v992_v62, %v954_v8  ;;  %v1007_v43 = vmul.f32 %v992_v62, %v955_v48  ;;  %v1014_v61 = vmul.f32 %v992_v62, %v3952_v39  ;;  %v1015_v13 = vmul.f32 %v992_v62, %v3953_v5  ;;  %v3961_v39 = vld [vmem:[#allocation24_spill] sm:$0xff] }
 0x273   :  { %v1008_v52 = vmul.f32 %v996_v11, %v3954_v20  ;;  %v1009_v18 = vmul.f32 %v996_v11, %v3955_v63  ;;  %v1016_v50 = vmul.f32 %v996_v11, %v2932_v32  ;;  %v1017_v23 = vmul.f32 %v996_v11, %v2936_v25 }
 0x274   :  { %v3276_v42 = vadd.f32 %v1006_v10, %v888_v3  ;;  %v3278_v27 = vadd.f32 %v1007_v43, %v889_v53  ;;  %v3280_v40 = vadd.f32 %v1014_v61, %v896_v58  ;;  %v3282_v44 = vadd.f32 %v1015_v13, %v897_v56  ;;  %v3957_v3 = vld [vmem:[#allocation80_spill] sm:$0xff]  ;;  %v3959_v53 = vld [vmem:[#allocation9_spill] sm:$0xff] }
 0x275   :  { %v3284_v46 = vadd.f32 %v1008_v52, %v890_v34  ;;  %v3286_v31 = vadd.f32 %v1009_v18, %v891_v51  ;;  %v3288_v4 = vadd.f32 %v1016_v50, %v898_v45  ;;  %v3290_v21 = vadd.f32 %v1017_v23, %v899_v17  ;;  %v1000_v26 = vpop.permute.xlu0 %999  ;;  %v1004_v32 = vpop.permute.xlu1 %1003  ;;  %v3962_v18 = vld [vmem:[#allocation34_spill] sm:$0xff] }
 0x276   :  { %v1010_v25 = vmul.f32 %v1000_v26, %v3956_v28  ;;  %v1011_v30 = vmul.f32 %v1000_v26, %v3957_v3  ;;  %v1018_v49 = vmul.f32 %v1000_v26, %v3958_v15  ;;  %v1019_v58 = vmul.f32 %v1000_v26, %v967_v54 }
 0x277   :  { %v1012_v56 = vmul.f32 %v1004_v32, %v3959_v53  ;;  %v1013_v34 = vmul.f32 %v1004_v32, %v3960_v60  ;;  %v1020_v8 = vmul.f32 %v1004_v32, %v968_v37  ;;  %v1021_v51 = vmul.f32 %v1004_v32, %v969_v41  ;;  %v3963_v32 = vld [vmem:[#allocation37_spill] sm:$0xff]  ;;  %v1753_v60 = vld [vmem:[%s3742_s1 + $0x18] ss:$0 sm:$0xff] }
 0x278   :  { %v3297_v36 = vadd.f32 %v1010_v25, %v892_v1  ;;  %v3299_v45 = vadd.f32 %v1011_v30, %v893_v38  ;;  %v3301_v17 = vadd.f32 %v1018_v49, %v900_v47  ;;  %v3303_v48 = vadd.f32 %v1019_v58, %v901_v6  ;;  %v3964_v25 = vld [vmem:[#allocation36_spill] sm:$0xff]  ;;  %v3965_v58 = vld [vmem:[#allocation39_spill] sm:$0xff] }
 0x279   :  { %v3305_v62 = vadd.f32 %v1012_v56, %v894_v59  ;;  %v3307_v11 = vadd.f32 %v1013_v34, %v895_v2  ;;  %v3309_v10 = vadd.f32 %v1020_v8, %v902_v7  ;;  %v3311_v54 = vadd.f32 %v1021_v51, %v903_v35  ;;  %v1754_v56 = vld [vmem:[%s3742_s1 + $0x19] ss:$0 sm:$0xff]  ;;  %v1756_v34 = vld [vmem:[%s3742_s1 + $0x1b] ss:$0 sm:$0xff]  ;;  %v1755_v8 = vld [vmem:[%s3742_s1 + $0x1a] ss:$0 sm:$0xff] }
 0x27a   :  { %v1758_v51 = vld [vmem:[%s3742_s1 + $0x1d] ss:$0 sm:$0xff] }
 0x2bd   :  { %v1120_v43 = vpop.permute.xlu0 %1119 }
 0x2be   :  { %v3315_v37 = vsel %vm181_vm1, %v1120_v43, %v3961_v39  ;;  %v1757_v43 = vld [vmem:[%s3742_s1 + $0x1c] ss:$0 sm:$0xff] }
 0x2bf   :  { %1189 = vrot.lane.b32.xlu0 %v3315_v37, %s1912_s5 }
 0x2c1   :  { %v1124_v41 = vpop.permute.xlu0 %1123  ;;  %v1122_v1 = vpop.permute.xlu1 %1121 }
 0x2c2   :  { %v3321_v47 = vsel %vm181_vm1, %v1124_v41, %v3898_v55  ;;  %v3325_v38 = vsel %vm181_vm1, %v1122_v1, %v3897_v16  ;;  %v1760_v41 = vld [vmem:[%s3742_s1 + $0x1f] ss:$0 sm:$0xff]  ;;  %v1759_v1 = vld [vmem:[%s3742_s1 + $0x1e] ss:$0 sm:$0xff] }
 0x2c3   :  { %1193 = vrot.lane.b32.xlu0 %v3321_v47, %s1912_s5  ;;  %1191 = vrot.lane.b32.xlu1 %v3325_v38, %s1912_s5 }
 0x2c5   :  { %v1128_v59 = vpop.permute.xlu0 %1127  ;;  %v1126_v2 = vpop.permute.xlu1 %1125 }
 0x2c6   :  { %v3333_v6 = vsel %vm181_vm1, %v1128_v59, %v3903_v24  ;;  %v3337_v7 = vsel %vm181_vm1, %v1126_v2, %v3902_v14  ;;  %v1762_v59 = vld [vmem:[%s3742_s1 + $0x21] ss:$0 sm:$0xff]  ;;  %v1761_v2 = vld [vmem:[%s3742_s1 + $0x20] ss:$0 sm:$0xff] }
 0x2c7   :  { %1197 = vrot.lane.b32.xlu0 %v3333_v6, %s1912_s5  ;;  %1195 = vrot.lane.b32.xlu1 %v3337_v7, %s1912_s5 }
 0x2c9   :  { %v1132_v35 = vpop.permute.xlu0 %1131  ;;  %v1130_v61 = vpop.permute.xlu1 %1129 }
 0x2ca   :  { %v3345_v5 = vsel %vm181_vm1, %v1132_v35, %v3909_v12  ;;  %v3349_v13 = vsel %vm181_vm1, %v1130_v61, %v3908_v9  ;;  %v1764_v61 = vld [vmem:[%s3742_s1 + $0x23] ss:$0 sm:$0xff] }
 0x2cb   :  { %1201 = vrot.lane.b32.xlu0 %v3345_v5, %s1912_s5  ;;  %1199 = vrot.lane.b32.xlu1 %v3349_v13, %s1912_s5 }
 0x2cd   :  { %v1136_v20 = vpop.permute.xlu0 %1135  ;;  %v1134_v52 = vpop.permute.xlu1 %1133 }
 0x2ce   :  { %v3357_v63 = vsel %vm181_vm1, %v1136_v20, %v3916_v22  ;;  %v3361_v50 = vsel %vm181_vm1, %v1134_v52, %v3962_v18  ;;  %v1763_v20 = vld [vmem:[%s3742_s1 + $0x22] ss:$0 sm:$0xff] }
 0x2cf   :  { %1205 = vrot.lane.b32.xlu0 %v3357_v63, %s1912_s5  ;;  %1203 = vrot.lane.b32.xlu1 %v3361_v50, %s1912_s5 }
 0x2d1   :  { %v1140_v23 = vpop.permute.xlu0 %1139  ;;  %v1138_v26 = vpop.permute.xlu1 %1137 }
 0x2d2   :  { %v1161_v28 = vsel %vm181_vm1, %v1140_v23, %v3963_v32  ;;  %v1160_v3 = vsel %vm181_vm1, %v1138_v26, %v3964_v25 }
 0x2d3   :  { %1209 = vrot.lane.b32.xlu0 %v1161_v28, %s1912_s5  ;;  %1207 = vrot.lane.b32.xlu1 %v1160_v3, %s1912_s5 }
 0x2d5   :  { %v1144_v30 = vpop.permute.xlu0 %1143  ;;  %v1142_v15 = vpop.permute.xlu1 %1141 }
 0x2d6   :  { %v1163_v49 = vsel %vm181_vm1, %v1144_v30, %v3935_v29  ;;  %v1162_v53 = vsel %vm181_vm1, %v1142_v15, %v3965_v58 }
 0x2d7   :  { %1213 = vrot.lane.b32.xlu0 %v1163_v49, %s1912_s5  ;;  %1211 = vrot.lane.b32.xlu1 %v1162_v53, %s1912_s5 }
 0x2d9   :  { %v1146_v35 = vpop.permute.xlu1 %1145  ;;  %v1148_v52 = vpop.permute.xlu0 %1147 }
 0x2da   :  { %v1165_v23 = vsel %vm181_vm1, %v1148_v52, %v3938_v33  ;;  %v1164_v26 = vsel %vm181_vm1, %v1146_v35, %v3937_v0 }
 0x2db   :  { %1278 = vperm.xlu0 %1793, %v1754_v56   ;;  %1274 = vperm.xlu1 %1794, %v1753_v60   ;;  %v1765_v56 = vld [vmem:[%s3743_s2] ss:$0 sm:$0xff]  ;;  %v1767_v60 = vld [vmem:[%s3743_s2 + $0x2] ss:$0 sm:$0xff] }
 0x2dd   :  { %v1150_v30 = vpop.permute.xlu1 %1149 }
 0x2de   :  { %v1166_v15 = vsel %vm181_vm1, %v1150_v30, %v3947_v19 }
 0x2df   :  { %1286 = vperm.xlu0 %1793, %v1756_v34   ;;  %1282 = vperm.xlu1 %1794, %v1755_v8   ;;  %v1766_v34 = vld [vmem:[%s3743_s2 + $0x1] ss:$0 sm:$0xff]  ;;  %v1768_v8 = vld [vmem:[%s3743_s2 + $0x3] ss:$0 sm:$0xff]  ;;  %s1914_s2 = smov [#allocation5]  }
 0x2e3   :  { %1366 = vperm.xlu0 %1793, %v1758_v51   ;;  %1362 = vperm.xlu1 %1794, %v1757_v43  }
 0x2e7   :  { %1374 = vperm.xlu0 %1793, %v1760_v41   ;;  %1370 = vperm.xlu1 %1794, %v1759_v1  }
 0x2eb   :  { %1504 = vperm.xlu0 %1793, %v1762_v59   ;;  %1500 = vperm.xlu1 %1794, %v1761_v2  }
 0x2ef   :  { %1512 = vperm.xlu0 %1793, %v1764_v61   ;;  %1508 = vperm.xlu1 %1794, %v1763_v20  }
 0x2f3   :  { %1217 = vrot.lane.b32.xlu0 %v1165_v23, %s1912_s5  ;;  %1215 = vrot.lane.b32.xlu1 %v1164_v26, %s1912_s5 }
 0x2f7   :  { %1568 = vperm.xlu0 %1793, %v1765_v56   ;;  %1219 = vrot.lane.b32.xlu1 %v1166_v15, %s1912_s5  ;;  %s1717_s5 = sshll.u32 %s1914_s2, 4  ;;  %s1718_s5 = int_to_ptr.vmem [resolvable:$true] %s1717_s5 }
 0x2f8   :  { %p1886_p9 = scmp.lt.s32.totalorder %s1718_s5, %s1718_s5 }
 0x2fb   :  { %1576 = vperm.xlu0 %1793, %v1767_v60   ;;  %1572 = vperm.xlu1 %1794, %v1766_v34  }
 0x2ff   :  { %1415 = vrot.lane.b32.xlu0 %v3315_v37, %s1913_s7  ;;  %1580 = vperm.xlu1 %1794, %v1768_v8  }
 0x303   :  { %1419 = vrot.lane.b32.xlu0 %v3321_v47, %s1913_s7  ;;  %1417 = vrot.lane.b32.xlu1 %v3325_v38, %s1913_s7 }
 0x307   :  { %1423 = vrot.lane.b32.xlu0 %v3333_v6, %s1913_s7  ;;  %1421 = vrot.lane.b32.xlu1 %v3337_v7, %s1913_s7 }
 0x30b   :  { %1427 = vrot.lane.b32.xlu0 %v3345_v5, %s1913_s7  ;;  %1425 = vrot.lane.b32.xlu1 %v3349_v13, %s1913_s7 }
 0x30f   :  { %1431 = vrot.lane.b32.xlu0 %v3357_v63, %s1913_s7  ;;  %1429 = vrot.lane.b32.xlu1 %v3361_v50, %s1913_s7 }
 0x313   :  { %1435 = vrot.lane.b32.xlu0 %v1161_v28, %s1913_s7  ;;  %1433 = vrot.lane.b32.xlu1 %v1160_v3, %s1913_s7  ;;  %v3966_v28 = vld [vmem:[#allocation8_spill] sm:$0xff] }
 0x314   :  { %v3462_v3 = vadd.s32 8, %v3966_v28 }
 0x316   :  { %vm93_vm8 = vcmp.lt.s32.totalorder %v3462_v3, 15 }
 0x317   :  { %1439 = vrot.lane.b32.xlu0 %v1163_v49, %s1913_s7  ;;  %1437 = vrot.lane.b32.xlu1 %v1162_v53, %s1913_s7  ;;  %vm3469_vm9 = vmand %vm93_vm8, %vm94_vm5 }
 0x318   :  { %vm3586_vm10 = vmand %vm93_vm8, %vm95_vm4 }
 0x31b   :  { %1443 = vrot.lane.b32.xlu0 %v1165_v23, %s1913_s7  ;;  %1441 = vrot.lane.b32.xlu1 %v1164_v26, %s1913_s7 }
 0x31f   :  { %1445 = vrot.lane.b32.xlu1 %v1166_v15, %s1913_s7  ;;  %s1881_s7 = scalar_lea.vmem %s1718_s5, 2048 }
 0x320   :  { %p1882_p8 = scmp.ne.s32.totalorder %s1718_s5, %s1881_s7  ;;  %p1887_p10 = scmp.lt.s32.totalorder %s1881_s7, %s1881_s7 }
 0x322   :  { %p1888_p11 = por %p1887_p10, %p1886_p9 }
 0x324   :  { %p1889_p12 = pnand %p1888_p11, %p1882_p8 }
 0x331   :  { %v1190_v37 = vpop.permute.xlu0 %1189 }
 0x332   :  { %v1237_v1 = vsel %vm94_vm5, %v1190_v37, 0.0 }
 0x335   :  { %v1192_v47 = vpop.permute.xlu1 %1191  ;;  %v1194_v38 = vpop.permute.xlu0 %1193 }
 0x336   :  { %v1238_v59 = vsel %vm3469_vm9, %v1192_v47, 0.0  ;;  %v1239_v2 = vsel %vm94_vm5, %v1194_v38, 0.0 }
 0x339   :  { %v1196_v6 = vpop.permute.xlu1 %1195  ;;  %v1198_v7 = vpop.permute.xlu0 %1197 }
 0x33a   :  { %v1240_v35 = vsel %vm3469_vm9, %v1196_v6, 0.0  ;;  %v1241_v61 = vsel %vm94_vm5, %v1198_v7, 0.0 }
 0x33d   :  { %v1200_v5 = vpop.permute.xlu1 %1199  ;;  %v1202_v13 = vpop.permute.xlu0 %1201 }
 0x33e   :  { %v1242_v20 = vsel %vm3469_vm9, %v1200_v5, 0.0  ;;  %v1243_v52 = vsel %vm94_vm5, %v1202_v13, 0.0 }
 0x341   :  { %v1204_v63 = vpop.permute.xlu1 %1203  ;;  %v1206_v50 = vpop.permute.xlu0 %1205 }
 0x342   :  { %v1244_v23 = vsel %vm3469_vm9, %v1204_v63, 0.0  ;;  %v1245_v26 = vsel %vm94_vm5, %v1206_v50, 0.0 }
 0x345   :  { %v1208_v49 = vpop.permute.xlu1 %1207  ;;  %v1210_v53 = vpop.permute.xlu0 %1209 }
 0x346   :  { %v1246_v30 = vsel %vm3469_vm9, %v1208_v49, 0.0  ;;  %v1247_v15 = vsel %vm94_vm5, %v1210_v53, 0.0 }
 0x349   :  { %v1212_v43 = vpop.permute.xlu1 %1211  ;;  %v1214_v41 = vpop.permute.xlu0 %1213 }
 0x34a   :  { %v1248_v56 = vsel %vm3469_vm9, %v1212_v43, 0.0  ;;  %v1249_v60 = vsel %vm94_vm5, %v1214_v41, 0.0 }
 0x35a   :  { %v1279_v34 = vpop.permute.xlu0 %1278  ;;  %v1275_v8 = vpop.permute.xlu1 %1274 }
 0x35b   :  { %v1291_v37 = vmul.f32 %v1279_v34, %v1239_v2  ;;  %v1292_v47 = vmul.f32 %v1279_v34, %v1240_v35  ;;  %v1299_v38 = vmul.f32 %v1279_v34, %v1247_v15  ;;  %v1300_v6 = vmul.f32 %v1279_v34, %v1248_v56 }
 0x35c   :  { %v1289_v7 = vmul.f32 %v1275_v8, %v1237_v1  ;;  %v1290_v5 = vmul.f32 %v1275_v8, %v1238_v59  ;;  %v1297_v13 = vmul.f32 %v1275_v8, %v1245_v26  ;;  %v1298_v63 = vmul.f32 %v1275_v8, %v1246_v30 }
 0x35d   :  { %v1307_v50 = vadd.f32 %v1291_v37, %v3284_v46  ;;  %v3501_v28 = vadd.f32 %v1292_v47, %v3286_v31  ;;  %v3504_v49 = vadd.f32 %v1299_v38, %v3288_v4  ;;  %v3507_v53 = vadd.f32 %v1300_v6, %v3290_v21 }
 0x35e   :  { %v1287_v43 = vpop.permute.xlu0 %1286  ;;  %v1283_v41 = vpop.permute.xlu1 %1282  ;;  %v1305_v2 = vadd.f32 %v1289_v7, %v3276_v42  ;;  %v1306_v1 = vadd.f32 %v1290_v5, %v3278_v27  ;;  %v3512_v59 = vadd.f32 %v1297_v13, %v3280_v40  ;;  %v3515_v46 = vadd.f32 %v1298_v63, %v3282_v44 }
 0x35f   :  { %v1295_v31 = vmul.f32 %v1287_v43, %v1243_v52  ;;  %v1296_v35 = vmul.f32 %v1287_v43, %v1244_v23  ;;  %v1293_v26 = vmul.f32 %v1283_v41, %v1241_v61  ;;  %v1294_v4 = vmul.f32 %v1283_v41, %v1242_v20 }
 0x360   :  { %v1301_v30 = vmul.f32 %v1283_v41, %v1249_v60 }
 0x361   :  { %v3518_v21 = vadd.f32 %v1293_v26, %v3297_v36  ;;  %v3521_v15 = vadd.f32 %v1295_v31, %v3305_v62  ;;  %v3524_v42 = vadd.f32 %v1294_v4, %v3299_v45  ;;  %v3527_v27 = vadd.f32 %v1296_v35, %v3307_v11 }
 0x362   :  { %v3529_v40 = vpop.permute.xlu0 %1366  ;;  %v3531_v44 = vpop.permute.xlu1 %1362  ;;  %v3534_v61 = vadd.f32 %v1301_v30, %v3301_v17  ;;  %v1332_v30 = vsel %vm93_vm8, %v3962_v18, 0.0 }
 0x363   :  { %v1379_v51 = vmul.f32 %v3529_v40, %v3898_v55  ;;  %v1328_v55 = vsel %vm93_vm8, %v3902_v14, 0.0 }
 0x366   :  { %v3536_v20 = vpop.permute.xlu0 %1374  ;;  %v3538_v36 = vpop.permute.xlu1 %1370 }
 0x367   :  { %v1381_v14 = vmul.f32 %v3538_v36, %v3903_v24  ;;  %v3620_v24 = vsel %vm93_vm8, %v3947_v19, 0.0 }
 0x36a   :  { %v3540_v52 = vpop.permute.xlu0 %1504  ;;  %v3542_v62 = vpop.permute.xlu1 %1500 }
 0x36e   :  { %v3544_v45 = vpop.permute.xlu0 %1512  ;;  %v3546_v23 = vpop.permute.xlu1 %1508 }
 0x372   :  { %v1218_v11 = vpop.permute.xlu0 %1217  ;;  %v1216_v56 = vpop.permute.xlu1 %1215 }
 0x373   :  { %v1251_v60 = vsel %vm94_vm5, %v1218_v11, 0.0  ;;  %v1250_v17 = vsel %vm3469_vm9, %v1216_v56, 0.0  ;;  %v1330_v11 = vsel %vm93_vm8, %v3908_v9, 0.0 }
 0x374   :  { %v1303_v34 = vmul.f32 %v1287_v43, %v1251_v60  ;;  %v1302_v8 = vmul.f32 %v1283_v41, %v1250_v17 }
 0x376   :  { %v3553_v37 = vadd.f32 %v1303_v34, %v3309_v10  ;;  %v3556_v47 = vadd.f32 %v1302_v8, %v3303_v48  ;;  %v3558_v38 = vpop.permute.xlu0 %1568  ;;  %v1220_v6 = vpop.permute.xlu1 %1219  ;;  %v1377_v10 = vmul.f32 %v3531_v44, %v3961_v39  ;;  %v1326_v48 = vsel %vm93_vm8, %v3897_v16, 0.0 }
 0x377   :  { %v1252_v7 = vsel %vm3469_vm9, %v1220_v6, 0.0  ;;  %v1336_v39 = vsel %vm93_vm8, %v3965_v58, 0.0  ;;  %v1395_v34 = vadd.f32 %v1379_v51, %v1307_v50  ;;  %v3625_v50 = vsel %vm93_vm8, %v3937_v0, 0.0 }
 0x378   :  { %v1304_v5 = vmul.f32 %v1287_v43, %v1252_v7  ;;  %v1378_v43 = vmul.f32 %v3531_v44, %v1326_v48  ;;  %v1393_v26 = vadd.f32 %v1377_v10, %v1305_v2  ;;  %v1334_v2 = vsel %vm93_vm8, %v3964_v25, 0.0 }
 0x379   :  { %v1380_v7 = vmul.f32 %v3529_v40, %v1328_v55  ;;  %v1385_v55 = vmul.f32 %v3531_v44, %v3916_v22 }
 0x37a   :  { %v3563_v13 = vadd.f32 %v1304_v5, %v3311_v54  ;;  %v3565_v63 = vpop.permute.xlu0 %1576  ;;  %v3567_v31 = vpop.permute.xlu1 %1572  ;;  %v1394_v6 = vadd.f32 %v1378_v43, %v1306_v1  ;;  %v1387_v5 = vmul.f32 %v3529_v40, %v3963_v32  ;;  %v1383_v1 = vmul.f32 %v3536_v20, %v3909_v12 }
 0x37b   :  { %v1382_v32 = vmul.f32 %v3538_v36, %v1330_v11  ;;  %v1397_v43 = vadd.f32 %v1381_v14, %v3518_v21  ;;  %v1396_v21 = vadd.f32 %v1380_v7, %v3501_v28 }
 0x37e   :  { %v1416_v41 = vpop.permute.xlu0 %1415  ;;  %v3574_v35 = vpop.permute.xlu1 %1580 }
 0x37f   :  { %v1463_v54 = vsel %vm95_vm4, %v1416_v41, 0.0 }
 0x380   :  { %v1515_v4 = vmul.f32 %v3542_v62, %v1463_v54 }
 0x382   :  { %v1531_v56 = vadd.f32 %v1515_v4, %v1393_v26  ;;  %v1420_v60 = vpop.permute.xlu0 %1419  ;;  %v1418_v17 = vpop.permute.xlu1 %1417  ;;  %v1388_v4 = vmul.f32 %v3529_v40, %v1336_v39  ;;  %v1398_v40 = vadd.f32 %v1382_v32, %v3524_v42 }
 0x383   :  { %v1465_v58 = vsel %vm95_vm4, %v1420_v60, 0.0  ;;  %v1464_v25 = vsel %vm3586_vm10, %v1418_v17, 0.0 }
 0x384   :  { %v1583_v8 = vadd.f32 %v3558_v38, %v1531_v56  ;;  %v1517_v18 = vmul.f32 %v3540_v52, %v1465_v58  ;;  %v1516_v9 = vmul.f32 %v3542_v62, %v1464_v25 }
 0x386   :  { %v1769_v10 = vmul.f32 -1.442695, %v1583_v8  ;;  %v1533_v48 = vadd.f32 %v1517_v18, %v1395_v34  ;;  %v1532_v41 = vadd.f32 %v1516_v9, %v1394_v6  ;;  %v1424_v51 = vpop.permute.xlu0 %1423  ;;  %v1422_v54 = vpop.permute.xlu1 %1421  ;;  %v1399_v34 = vadd.f32 %v1383_v1, %v3521_v15 }
 0x387   :  { %v1467_v19 = vsel %vm95_vm4, %v1424_v51, 0.0  ;;  %v1466_v3 = vsel %vm3586_vm10, %v1422_v54, 0.0  ;;  %v1386_v6 = vmul.f32 %v3531_v44, %v1334_v2  ;;  %v1384_v15 = vmul.f32 %v3536_v20, %v1332_v30 }
 0x388   :  { %1795 = vpow2.f32 %v1769_v10  ;;  %v1585_v0 = vadd.f32 %v3567_v31, %v1533_v48  ;;  %v1584_v12 = vadd.f32 %v3558_v38, %v1532_v41  ;;  %v1519_v26 = vmul.f32 %v3546_v23, %v1467_v19 }
 0x389   :  { %v1518_v11 = vmul.f32 %v3540_v52, %v1466_v3  ;;  %v1403_v41 = vadd.f32 %v1387_v5, %v3504_v49  ;;  %v1401_v54 = vadd.f32 %v1385_v55, %v3512_v59  ;;  %v1400_v19 = vadd.f32 %v1384_v15, %v3527_v27 }
 0x38a   :  { %v1771_v56 = vmul.f32 -1.442695, %v1585_v0  ;;  %v1770_v60 = vmul.f32 -1.442695, %v1584_v12  ;;  %v1535_v17 = vadd.f32 %v1519_v26, %v1397_v43  ;;  %v1428_v14 = vpop.permute.xlu0 %1427  ;;  %v1426_v58 = vpop.permute.xlu1 %1425  ;;  %v1404_v59 = vadd.f32 %v1388_v4, %v3507_v53 }
 0x38b   :  { %v1534_v25 = vadd.f32 %v1518_v11, %v1396_v21  ;;  %v1469_v8 = vsel %vm95_vm4, %v1428_v14, 0.0  ;;  %v1468_v22 = vsel %vm3586_vm10, %v1426_v58, 0.0  ;;  %v1402_v55 = vadd.f32 %v1386_v6, %v3515_v46 }
 0x38c   :  { %1797 = vpow2.f32 %v1771_v56  ;;  %v1587_v28 = vadd.f32 %v3565_v63, %v1535_v17  ;;  %v1521_v39 = vmul.f32 %v3544_v45, %v1469_v8  ;;  %v1520_v18 = vmul.f32 %v3546_v23, %v1468_v22 }
 0x38d   :  { %1799 = vpow2.f32 %v1770_v60  ;;  %v1586_v9 = vadd.f32 %v3567_v31, %v1534_v25  ;;  %v1391_v14 = vmul.f32 %v3536_v20, %v3938_v33  ;;  %v1389_v46 = vmul.f32 %v3538_v36, %v3935_v29 }
 0x38e   :  { %v1773_v7 = vmul.f32 -1.442695, %v1587_v28  ;;  %v1537_v1 = vadd.f32 %v1521_v39, %v1399_v34  ;;  %v1536_v42 = vadd.f32 %v1520_v18, %v1398_v40  ;;  %v1432_v10 = vpop.permute.xlu0 %1431  ;;  %v1430_v48 = vpop.permute.xlu1 %1429 }
 0x38f   :  { %v1772_v51 = vmul.f32 -1.442695, %v1586_v9  ;;  %v1471_v32 = vsel %vm95_vm4, %v1432_v10, 0.0  ;;  %v1470_v44 = vsel %vm3586_vm10, %v1430_v48, 0.0  ;;  %v1390_v48 = vmul.f32 %v3538_v36, %v3625_v50 }
 0x390   :  { %1801 = vpow2.f32 %v1773_v7  ;;  %v1589_v2 = vadd.f32 %v3574_v35, %v1537_v1  ;;  %v1588_v30 = vadd.f32 %v3565_v63, %v1536_v42  ;;  %v1523_v43 = vmul.f32 %v3542_v62, %v1471_v32 }
 0x391   :  { %1803 = vpow2.f32 %v1772_v51  ;;  %v1522_v49 = vmul.f32 %v3544_v45, %v1470_v44  ;;  %v1405_v7 = vadd.f32 %v1389_v46, %v3534_v61 }
 0x392   :  { %v1796_v5 = vpop.eup %1795  ;;  %v1775_v3 = vmul.f32 -1.442695, %v1589_v2  ;;  %v1774_v0 = vmul.f32 -1.442695, %v1588_v30  ;;  %v1539_v12 = vadd.f32 %v1523_v43, %v1401_v54  ;;  %v1436_v26 = vpop.permute.xlu0 %1435 }
 0x393   :  { %v1434_v21 = vpop.permute.xlu1 %1433  ;;  %v1647_v11 = vadd.f32 1.0, %v1796_v5  ;;  %v1538_v56 = vadd.f32 %v1522_v49, %v1400_v19  ;;  %v1473_v60 = vsel %vm95_vm4, %v1436_v26, 0.0  ;;  %v1407_v5 = vadd.f32 %v1391_v14, %v3553_v37 }
 0x394   :  { %v1472_v27 = vsel %vm3586_vm10, %v1434_v21, 0.0  ;;  %1805 = vpow2.f32 %v1775_v3  ;;  %v1591_v17 = vadd.f32 %v3558_v38, %v1539_v12  ;;  %v1525_v53 = vmul.f32 %v3540_v52, %v1473_v60 }
 0x395   :  { %v1524_v4 = vmul.f32 %v3542_v62, %v1472_v27  ;;  %1807 = vrcp.f32 %v1647_v11  ;;  %v1590_v34 = vadd.f32 %v3574_v35, %v1538_v56  ;;  %v1392_v12 = vmul.f32 %v3536_v20, %v3620_v24 }
 0x396   :  { %v1798_v58 = vpop.eup %1797  ;;  %1809 = vpow2.f32 %v1774_v0  ;;  %v1777_v25 = vmul.f32 -1.442695, %v1591_v17  ;;  %v1541_v8 = vadd.f32 %v1525_v53, %v1403_v41  ;;  %v1440_v22 = vpop.permute.xlu0 %1439 }
 0x397   :  { %v1540_v40 = vadd.f32 %v1524_v4, %v1402_v55  ;;  %v1438_v28 = vpop.permute.xlu1 %1437  ;;  %v1800_v39 = vpop.eup %1799  ;;  %v1649_v18 = vadd.f32 1.0, %v1798_v58  ;;  %v1776_v62 = vmul.f32 -1.442695, %v1590_v34  ;;  %v1475_v33 = vsel %vm95_vm4, %v1440_v22, 0.0 }
 0x398   :  { %v1474_v29 = vsel %vm3586_vm10, %v1438_v28, 0.0  ;;  %v1648_v6 = vadd.f32 1.0, %v1800_v39  ;;  %1811 = vpow2.f32 %v1777_v25  ;;  %v1593_v15 = vadd.f32 %v3567_v31, %v1541_v8 }
 0x399   :  { %v1592_v9 = vadd.f32 %v3558_v38, %v1540_v40  ;;  %1813 = vrcp.f32 %v1649_v18  ;;  %v1527_v1 = vmul.f32 %v3546_v23, %v1475_v33  ;;  %v1526_v42 = vmul.f32 %v3540_v52, %v1474_v29 }
 0x39a   :  { %v1802_v10 = vpop.eup %1801  ;;  %1815 = vrcp.f32 %v1648_v6  ;;  %v1779_v41 = vmul.f32 -1.442695, %v1593_v15  ;;  %v1444_v54 = vpop.permute.xlu0 %1443 }
 0x39b   :  { %v1778_v51 = vmul.f32 -1.442695, %v1592_v9  ;;  %v1442_v32 = vpop.permute.xlu1 %1441  ;;  %v1804_v44 = vpop.eup %1803  ;;  %v1651_v2 = vadd.f32 1.0, %v1802_v10  ;;  %1817 = vpow2.f32 %v1776_v62  ;;  %v1543_v38 = vadd.f32 %v1527_v1, %v1405_v7 }
 0x39c   :  { %v1542_v30 = vadd.f32 %v1526_v42, %v1404_v59  ;;  %v1650_v43 = vadd.f32 1.0, %v1804_v44  ;;  %1819 = vpow2.f32 %v1779_v41  ;;  %v1477_v61 = vsel %vm95_vm4, %v1444_v54, 0.0 }
 0x39d   :  { %v1476_v52 = vsel %vm3586_vm10, %v1442_v32, 0.0  ;;  %1821 = vrcp.f32 %v1651_v2  ;;  %v1595_v36 = vadd.f32 %v3565_v63, %v1543_v38  ;;  %v1529_v19 = vmul.f32 %v3544_v45, %v1477_v61 }
 0x39e   :  { %v1594_v50 = vadd.f32 %v3567_v31, %v1542_v30  ;;  %v1806_v49 = vpop.eup %1805  ;;  %1823 = vrcp.f32 %v1650_v43  ;;  %v1406_v59 = vadd.f32 %v1390_v48, %v3556_v47  ;;  %v1528_v3 = vmul.f32 %v3546_v23, %v1476_v52 }
 0x39f   :  { %v1446_v57 = vpop.permute.xlu1 %1445  ;;  %v1808_v0 = vpop.eup %1807  ;;  %v1653_v26 = vadd.f32 1.0, %v1806_v49  ;;  %1825 = vpow2.f32 %v1778_v51  ;;  %v1781_v55 = vmul.f32 -1.442695, %v1595_v36  ;;  %v1545_v11 = vadd.f32 %v1529_v19, %v1407_v5 }
 0x3a0   :  { %v1810_v21 = vpop.eup %1809  ;;  %1696 = vst.msk [vmem:[#allocation5] sm:$0xff] %vm1695_vm11, %v1808_v0  ;;  %v1780_v31 = vmul.f32 -1.442695, %v1594_v50  ;;  %v1544_v56 = vadd.f32 %v1528_v3, %v1406_v59  ;;  %v1478_v37 = vsel %vm3586_vm10, %v1446_v57, 0.0  ;;  %v1408_v23 = vadd.f32 %v1392_v12, %v3563_v13 }
 0x3a1   :  { %1827 = vrcp.f32 %v1653_v26  ;;  %v1652_v47 = vadd.f32 1.0, %v1810_v21  ;;  %v1530_v60 = vmul.f32 %v3544_v45, %v1478_v37  ;;  %v1597_v20 = vadd.f32 %v3574_v35, %v1545_v11 }
 0x3a2   :  { %v1812_v27 = vpop.eup %1811  ;;  %1829 = vpow2.f32 %v1781_v55  ;;  %v1596_v24 = vadd.f32 %v3565_v63, %v1544_v56 }
 0x3a3   :  { %v1814_v17 = vpop.eup %1813  ;;  %1831 = vrcp.f32 %v1652_v47  ;;  %v1655_v53 = vadd.f32 1.0, %v1812_v27  ;;  %v1546_v4 = vadd.f32 %v1530_v60, %v1408_v23  ;;  %v1783_v16 = vmul.f32 -1.442695, %v1597_v20 }
 0x3a4   :  { %v1816_v14 = vpop.eup %1815  ;;  %1698 = vst.msk [vmem:[#allocation5 + $0x10] sm:$0xff] %vm1695_vm11, %v1814_v17  ;;  %1833 = vpow2.f32 %v1780_v31  ;;  %v1782_v46 = vmul.f32 -1.442695, %v1596_v24 }
 0x3a5   :  { %v1818_v34 = vpop.eup %1817  ;;  %1697 = vst.msk [vmem:[#allocation5 + $0x8] sm:$0xff] %vm1695_vm11, %v1816_v14  ;;  %1835 = vrcp.f32 %v1655_v53  ;;  %v1598_v45 = vadd.f32 %v3574_v35, %v1546_v4 }
 0x3a6   :  { %v1820_v13 = vpop.eup %1819  ;;  %v1654_v58 = vadd.f32 1.0, %v1818_v34  ;;  %1837 = vpow2.f32 %v1783_v16 }
 0x3a7   :  { %v1822_v63 = vpop.eup %1821  ;;  %v1657_v25 = vadd.f32 1.0, %v1820_v13  ;;  %1839 = vpow2.f32 %v1782_v46  ;;  %v1784_v8 = vmul.f32 -1.442695, %v1598_v45 }
 0x3a8   :  { %v1824_v40 = vpop.eup %1823  ;;  %1700 = vst.msk [vmem:[#allocation5 + $0x20] sm:$0xff] %vm1695_vm11, %v1822_v63  ;;  %1841 = vrcp.f32 %v1654_v58 }
 0x3a9   :  { %v1826_v22 = vpop.eup %1825  ;;  %1699 = vst.msk [vmem:[#allocation5 + $0x18] sm:$0xff] %vm1695_vm11, %v1824_v40  ;;  %1843 = vrcp.f32 %v1657_v25 }
 0x3aa   :  { %v1656_v28 = vadd.f32 1.0, %v1826_v22  ;;  %1845 = vpow2.f32 %v1784_v8 }
 0x3ab   :  { %v1828_v39 = vpop.eup %1827 }
 0x3ac   :  { %v1830_v18 = vpop.eup %1829  ;;  %1702 = vst.msk [vmem:[#allocation5 + $0x30] sm:$0xff] %vm1695_vm11, %v1828_v39  ;;  %1847 = vrcp.f32 %v1656_v28 }
 0x3ad   :  { %v1832_v35 = vpop.eup %1831  ;;  %v1659_v62 = vadd.f32 1.0, %v1830_v18 }
 0x3ae   :  { %v1834_v33 = vpop.eup %1833  ;;  %1701 = vst.msk [vmem:[#allocation5 + $0x28] sm:$0xff] %vm1695_vm11, %v1832_v35 }
 0x3af   :  { %v1836_v29 = vpop.eup %1835  ;;  %1849 = vrcp.f32 %v1659_v62  ;;  %v1658_v6 = vadd.f32 1.0, %v1834_v33 }
 0x3b0   :  { %v1838_v15 = vpop.eup %1837  ;;  %1704 = vst.msk [vmem:[#allocation5 + $0x40] sm:$0xff] %vm1695_vm11, %v1836_v29 }
 0x3b1   :  { %v1840_v9 = vpop.eup %1839  ;;  %1851 = vrcp.f32 %v1658_v6  ;;  %v1661_v7 = vadd.f32 1.0, %v1838_v15 }
 0x3b2   :  { %v1842_v1 = vpop.eup %1841  ;;  %v1660_v42 = vadd.f32 1.0, %v1840_v9 }
 0x3b3   :  { %v1844_v10 = vpop.eup %1843  ;;  %1703 = vst.msk [vmem:[#allocation5 + $0x38] sm:$0xff] %vm1695_vm11, %v1842_v1  ;;  %1853 = vrcp.f32 %v1661_v7 }
 0x3b4   :  { %v1846_v48 = vpop.eup %1845  ;;  %1706 = vst.msk [vmem:[#allocation5 + $0x50] sm:$0xff] %vm1695_vm11, %v1844_v10  ;;  %1855 = vrcp.f32 %v1660_v42 }
 0x3b5   :  { %v1662_v41 = vadd.f32 1.0, %v1846_v48 }
 0x3b6   :  { %v1848_v51 = vpop.eup %1847 }
 0x3b7   :  { %1705 = vst.msk [vmem:[#allocation5 + $0x48] sm:$0xff] %vm1695_vm11, %v1848_v51  ;;  %1857 = vrcp.f32 %v1662_v41 }
 0x3b9   :  { %v1850_v54 = vpop.eup %1849 }
 0x3ba   :  { %1708 = vst.msk [vmem:[#allocation5 + $0x60] sm:$0xff] %vm1695_vm11, %v1850_v54 }
 0x3bb   :  { %v1852_v32 = vpop.eup %1851 }
 0x3bc   :  { %1707 = vst.msk [vmem:[#allocation5 + $0x58] sm:$0xff] %vm1695_vm11, %v1852_v32 }
 0x3bd   :  { %v1854_v44 = vpop.eup %1853 }
 0x3be   :  { %v1856_v2 = vpop.eup %1855  ;;  %1710 = vst.msk [vmem:[#allocation5 + $0x70] sm:$0xff] %vm1695_vm11, %v1854_v44 }
 0x3bf   :  { %1709 = vst.msk [vmem:[#allocation5 + $0x68] sm:$0xff] %vm1695_vm11, %v1856_v2 }
 0x3c1   :  { %v1858_v38 = vpop.eup %1857 }
 0x3c2   :  { %1711 = vst.msk [vmem:[#allocation5 + $0x78] sm:$0xff] %vm1695_vm11, %v1858_v38 }
 0x3c3   :  { %1892 = shalt.err (!%p1889_p12)
}
 0x3c4   :  { %s1893_s9 = scalar_lea.hbm %s3744_s3, 2048 }
 0x3c5   :  { %p1894_p13 = scmp.ne.s32.totalorder %s3744_s3, %s1893_s9  ;;  %p1897_p0 = scmp.lt.u32.totalorder %s1893_s9, %s3744_s3 }
 0x3c7   :  { %p1899_p1 = pnand %p1897_p0, %p1894_p13 }
 0x3c9   :  { %1902 = shalt.err (!%p1899_p1)
}
 0x3ca   :  { %1723 = dma.vmem_to_hbm [thread:$0]  %s1718_s5, 2048, %s3744_s3, [#allocation4], %s1908_s22, %s1908_s22, %s1909_s23  }
 0x3cb   :  { %1905 = dma.done.wait [#allocation4], 2048  }
 0x3cc   :  { %1906 = vsyncadd [#allocation4], 4294965248 }
 0x3cd   :  { %1727 = vsyncpa [#allocation3], 1 }
 0x3ce   :  { %1728 = vsyncpa [#allocation4], 1 }

</bundles_post_ra>
